<compile_context>
chip_gen: v7x
topology: tpu7x:2x2x1
jax: 0.10.0
libtpu: 0.0.40
codegen_flags: <defaults>
</compile_context>

<pallas_src>
import functools

import jax
import jax.numpy as jnp
from jax.experimental import pallas as pl
from jax.experimental.pallas import tpu as pltpu

LEAKY_SLOPE = 0.01  # torch.nn.LeakyReLU default


def _leaky_relu(x):
    return jnp.where(x >= 0, x, LEAKY_SLOPE * x)


def _realnvp_kernel(x_ref, *refs, num_layers, d_left, reverse):
    """Fused RealNVP forward: all coupling layers on a VMEM-resident x block.

    refs = (w1, b1, w2, b2, w3_s, b3_s, w3_t, b3_t) * num_layers, out_ref
    Weights are stored (in_features, out_features) so each step is a @ W + b.
    """
    param_refs = refs[:-1]
    out_ref = refs[-1]

    x = x_ref[...]
    # Split once; positions are preserved across layers (identity only toggles
    # which half is conditioned on and which is transformed).
    left = x[:, :d_left]
    right = x[:, d_left:]

    order = list(range(num_layers))
    if reverse:
        order = order[::-1]

    for i in order:  # static unroll
        w1, b1, w2, b2, w3s, b3s, w3t, b3t = (
            param_refs[8 * i + j][...] for j in range(8))
        identity = i % 2
        a, b = (left, right) if identity == 0 else (right, left)

        h = jnp.dot(a, w1, preferred_element_type=jnp.float32) + b1
        h = _leaky_relu(h)
        h = jnp.dot(h, w2, preferred_element_type=jnp.float32) + b2
        h = _leaky_relu(h)
        s = jnp.dot(h, w3s, preferred_element_type=jnp.float32) + b3s
        t = jnp.dot(h, w3t, preferred_element_type=jnp.float32) + b3t

        if reverse:
            b_new = (b - t) * jnp.exp(-s)
        else:
            b_new = b * jnp.exp(s) + t

        if identity == 0:
            right = b_new
        else:
            left = b_new

    out_ref[...] = jnp.concatenate([left, right], axis=1)


def realnvp_forward(x, params, reverse=False, block_batch=512):
    """Mirrors RealNVP.forward for a [B, dim] float32 input. One pallas_call."""
    batch, dim = x.shape
    num_layers = len(params)
    d_left = dim // 2
    flat_params = [p for layer in params for p in layer]

    bb = batch if batch <= block_batch else block_batch
    grid = (pl.cdiv(batch, bb),)

    x_spec = pl.BlockSpec((bb, dim), lambda i: (i, 0))
    # Weights: full-array blocks with a constant index_map -> loaded once,
    # stay resident in VMEM across all batch-grid steps.
    param_specs = [pl.BlockSpec(p.shape, lambda i: (0, 0)) for p in flat_params]

    kernel = functools.partial(
        _realnvp_kernel, num_layers=num_layers, d_left=d_left, reverse=reverse)

    return pl.pallas_call(
        kernel,
        out_shape=jax.ShapeDtypeStruct((batch, dim), jnp.float32),
        grid=grid,
        in_specs=[x_spec] + param_specs,
        out_specs=pl.BlockSpec((bb, dim), lambda i: (i, 0)),
        compiler_params=pltpu.CompilerParams(
            dimension_semantics=("parallel",)),
    )(x, *flat_params)


def init_realnvp_params(key, dim, num_layers, hidden_size, weights_init_std=0.1):
    """Deterministic init matching RealNVP._init_weights: randn * std for every
    Linear weight and bias.  Weights stored as (in_features, out_features); the
    final Linear is pre-split into s- and t-heads (torch.split order)."""
    params = []
    d = dim // 2
    for i in range(num_layers):
        identity = i % 2
        in_f = d if identity == 0 else dim - d
        out_f = dim - d if identity == 0 else d
        shapes = [
            (in_f, hidden_size), (1, hidden_size),
            (hidden_size, hidden_size), (1, hidden_size),
            (hidden_size, 2 * out_f), (1, 2 * out_f),
        ]
        vals = []
        for shape in shapes:
            key, sub = jax.random.split(key)
            vals.append(
                jax.random.normal(sub, shape, dtype=jnp.float32)
                * weights_init_std)
        w1, b1, w2, b2, w3, b3 = vals
        # torch: s, t = st.split(st.size(1) // 2, dim=1)  -> s first, t second.
        layer = (w1, b1, w2, b2,
                 w3[:, :out_f], b3[:, :out_f],
                 w3[:, out_f:], b3[:, out_f:])
        params.append(layer)
    return params


def realnvp_reference(x, params, reverse=False):
    """Pure-JAX reference (mirrors the PyTorch module) for correctness checks."""
    dim = x.shape[1]
    d = dim // 2
    order = range(len(params))
    if reverse:
        order = reversed(order)
    for i in order:
        w1, b1, w2, b2, w3s, b3s, w3t, b3t = params[i]
        identity = i % 2
        x1, x2 = x[:, :d], x[:, d:]
        a, b = (x1, x2) if identity == 0 else (x2, x1)
        h = _leaky_relu(a @ w1 + b1)
        h = _leaky_relu(h @ w2 + b2)
        s = h @ w3s + b3s
        t = h @ w3t + b3t
        if reverse:
            b = (b - t) * jnp.exp(-s)
        else:
            b = b * jnp.exp(s) + t
        x = (jnp.concatenate([b, a], axis=1) if identity != 0
             else jnp.concatenate([a, b], axis=1))
    return x


if __name__ == "__main__":
    dim = 4
    num_layers = 4
    hidden_size = 32
    batch = 8

    key = jax.random.PRNGKey(0)
    key, pkey, xkey = jax.random.split(key, 3)

    params = init_realnvp_params(pkey, dim, num_layers, hidden_size,
                                 weights_init_std=0.1)
    x = jax.random.normal(xkey, (batch, dim), dtype=jnp.float32)

    fwd = jax.jit(lambda xx: realnvp_forward(xx, params, reverse=False))
    inv = jax.jit(lambda yy: realnvp_forward(yy, params, reverse=True))

    y = jax.block_until_ready(fwd(x))
    x_rec = jax.block_until_ready(inv(y))

    # Check against the pure-JAX reference (catches s/t ordering / swap bugs
    # that a round-trip test alone would not).
    y_ref = realnvp_reference(x, params, reverse=False)
    assert y.shape == (batch, dim) and y.dtype == jnp.float32
    assert jnp.max(jnp.abs(y - y_ref)) < 1e-5, "mismatch vs pure-JAX reference"
    # Sanity: the flow must be invertible (forward then reverse recovers x).
    assert jnp.max(jnp.abs(x_rec - x)) < 1e-4, "round-trip inversion failed"

    print("KERNEL_OK")
</pallas_src>

<mosaic_0001>
module attributes {stable_mosaic.version = 11 : i64} {
  func.func @_realnvp_kernel(%arg0: i32, %arg1: memref<8x4xf32, #tpu.memory_space<vmem>>, %arg2: memref<2x32xf32, #tpu.memory_space<vmem>>, %arg3: memref<1x32xf32, #tpu.memory_space<vmem>>, %arg4: memref<32x32xf32, #tpu.memory_space<vmem>>, %arg5: memref<1x32xf32, #tpu.memory_space<vmem>>, %arg6: memref<32x2xf32, #tpu.memory_space<vmem>>, %arg7: memref<1x2xf32, #tpu.memory_space<vmem>>, %arg8: memref<32x2xf32, #tpu.memory_space<vmem>>, %arg9: memref<1x2xf32, #tpu.memory_space<vmem>>, %arg10: memref<2x32xf32, #tpu.memory_space<vmem>>, %arg11: memref<1x32xf32, #tpu.memory_space<vmem>>, %arg12: memref<32x32xf32, #tpu.memory_space<vmem>>, %arg13: memref<1x32xf32, #tpu.memory_space<vmem>>, %arg14: memref<32x2xf32, #tpu.memory_space<vmem>>, %arg15: memref<1x2xf32, #tpu.memory_space<vmem>>, %arg16: memref<32x2xf32, #tpu.memory_space<vmem>>, %arg17: memref<1x2xf32, #tpu.memory_space<vmem>>, %arg18: memref<2x32xf32, #tpu.memory_space<vmem>>, %arg19: memref<1x32xf32, #tpu.memory_space<vmem>>, %arg20: memref<32x32xf32, #tpu.memory_space<vmem>>, %arg21: memref<1x32xf32, #tpu.memory_space<vmem>>, %arg22: memref<32x2xf32, #tpu.memory_space<vmem>>, %arg23: memref<1x2xf32, #tpu.memory_space<vmem>>, %arg24: memref<32x2xf32, #tpu.memory_space<vmem>>, %arg25: memref<1x2xf32, #tpu.memory_space<vmem>>, %arg26: memref<2x32xf32, #tpu.memory_space<vmem>>, %arg27: memref<1x32xf32, #tpu.memory_space<vmem>>, %arg28: memref<32x32xf32, #tpu.memory_space<vmem>>, %arg29: memref<1x32xf32, #tpu.memory_space<vmem>>, %arg30: memref<32x2xf32, #tpu.memory_space<vmem>>, %arg31: memref<1x2xf32, #tpu.memory_space<vmem>>, %arg32: memref<32x2xf32, #tpu.memory_space<vmem>>, %arg33: memref<1x2xf32, #tpu.memory_space<vmem>>, %arg34: memref<8x4xf32, #tpu.memory_space<vmem>>) attributes {dimension_semantics = [#tpu.dimension_semantics<parallel>], iteration_bounds = array<i64: 1>, scalar_prefetch = 0 : i64, scratch_operands = 0 : i64, tpu.core_type = #tpu.core_type<tc>, window_params = [{transform_indices = @transform_0, window_bounds = array<i64: 8, 4>}, {pipeline_mode = #tpu.pipeline_mode<synchronous>, transform_indices = @transform_1, window_bounds = array<i64: 2, 32>}, {pipeline_mode = #tpu.pipeline_mode<synchronous>, transform_indices = @transform_2, window_bounds = array<i64: 1, 32>}, {pipeline_mode = #tpu.pipeline_mode<synchronous>, transform_indices = @transform_3, window_bounds = array<i64: 32, 32>}, {pipeline_mode = #tpu.pipeline_mode<synchronous>, transform_indices = @transform_4, window_bounds = array<i64: 1, 32>}, {pipeline_mode = #tpu.pipeline_mode<synchronous>, transform_indices = @transform_5, window_bounds = array<i64: 32, 2>}, {pipeline_mode = #tpu.pipeline_mode<synchronous>, transform_indices = @transform_6, window_bounds = array<i64: 1, 2>}, {pipeline_mode = #tpu.pipeline_mode<synchronous>, transform_indices = @transform_7, window_bounds = array<i64: 32, 2>}, {pipeline_mode = #tpu.pipeline_mode<synchronous>, transform_indices = @transform_8, window_bounds = array<i64: 1, 2>}, {pipeline_mode = #tpu.pipeline_mode<synchronous>, transform_indices = @transform_9, window_bounds = array<i64: 2, 32>}, {pipeline_mode = #tpu.pipeline_mode<synchronous>, transform_indices = @transform_10, window_bounds = array<i64: 1, 32>}, {pipeline_mode = #tpu.pipeline_mode<synchronous>, transform_indices = @transform_11, window_bounds = array<i64: 32, 32>}, {pipeline_mode = #tpu.pipeline_mode<synchronous>, transform_indices = @transform_12, window_bounds = array<i64: 1, 32>}, {pipeline_mode = #tpu.pipeline_mode<synchronous>, transform_indices = @transform_13, window_bounds = array<i64: 32, 2>}, {pipeline_mode = #tpu.pipeline_mode<synchronous>, transform_indices = @transform_14, window_bounds = array<i64: 1, 2>}, {pipeline_mode = #tpu.pipeline_mode<synchronous>, transform_indices = @transform_15, window_bounds = array<i64: 32, 2>}, {pipeline_mode = #tpu.pipeline_mode<synchronous>, transform_indices = @transform_16, window_bounds = array<i64: 1, 2>}, {pipeline_mode = #tpu.pipeline_mode<synchronous>, transform_indices = @transform_17, window_bounds = array<i64: 2, 32>}, {pipeline_mode = #tpu.pipeline_mode<synchronous>, transform_indices = @transform_18, window_bounds = array<i64: 1, 32>}, {pipeline_mode = #tpu.pipeline_mode<synchronous>, transform_indices = @transform_19, window_bounds = array<i64: 32, 32>}, {pipeline_mode = #tpu.pipeline_mode<synchronous>, transform_indices = @transform_20, window_bounds = array<i64: 1, 32>}, {pipeline_mode = #tpu.pipeline_mode<synchronous>, transform_indices = @transform_21, window_bounds = array<i64: 32, 2>}, {pipeline_mode = #tpu.pipeline_mode<synchronous>, transform_indices = @transform_22, window_bounds = array<i64: 1, 2>}, {pipeline_mode = #tpu.pipeline_mode<synchronous>, transform_indices = @transform_23, window_bounds = array<i64: 32, 2>}, {pipeline_mode = #tpu.pipeline_mode<synchronous>, transform_indices = @transform_24, window_bounds = array<i64: 1, 2>}, {pipeline_mode = #tpu.pipeline_mode<synchronous>, transform_indices = @transform_25, window_bounds = array<i64: 2, 32>}, {pipeline_mode = #tpu.pipeline_mode<synchronous>, transform_indices = @transform_26, window_bounds = array<i64: 1, 32>}, {pipeline_mode = #tpu.pipeline_mode<synchronous>, transform_indices = @transform_27, window_bounds = array<i64: 32, 32>}, {pipeline_mode = #tpu.pipeline_mode<synchronous>, transform_indices = @transform_28, window_bounds = array<i64: 1, 32>}, {pipeline_mode = #tpu.pipeline_mode<synchronous>, transform_indices = @transform_29, window_bounds = array<i64: 32, 2>}, {pipeline_mode = #tpu.pipeline_mode<synchronous>, transform_indices = @transform_30, window_bounds = array<i64: 1, 2>}, {pipeline_mode = #tpu.pipeline_mode<synchronous>, transform_indices = @transform_31, window_bounds = array<i64: 32, 2>}, {pipeline_mode = #tpu.pipeline_mode<synchronous>, transform_indices = @transform_32, window_bounds = array<i64: 1, 2>}, {transform_indices = @transform_33, window_bounds = array<i64: 8, 4>}]} {
    %c0 = arith.constant 0 : index
    %c0_0 = arith.constant 0 : index
    %0 = vector.load %arg1[%c0, %c0_0] : memref<8x4xf32, #tpu.memory_space<vmem>>, vector<8x4xf32>
    %1 = vector.extract_strided_slice %0 {offsets = [0, 0], sizes = [8, 2], strides = [1, 1]} : vector<8x4xf32> to vector<8x2xf32>
    %2 = vector.extract_strided_slice %0 {offsets = [0, 2], sizes = [8, 2], strides = [1, 1]} : vector<8x4xf32> to vector<8x2xf32>
    %c0_1 = arith.constant 0 : index
    %c0_2 = arith.constant 0 : index
    %3 = vector.load %arg2[%c0_1, %c0_2] : memref<2x32xf32, #tpu.memory_space<vmem>>, vector<2x32xf32>
    %c0_3 = arith.constant 0 : index
    %c0_4 = arith.constant 0 : index
    %4 = vector.load %arg3[%c0_3, %c0_4] : memref<1x32xf32, #tpu.memory_space<vmem>>, vector<1x32xf32>
    %c0_5 = arith.constant 0 : index
    %c0_6 = arith.constant 0 : index
    %5 = vector.load %arg4[%c0_5, %c0_6] : memref<32x32xf32, #tpu.memory_space<vmem>>, vector<32x32xf32>
    %c0_7 = arith.constant 0 : index
    %c0_8 = arith.constant 0 : index
    %6 = vector.load %arg5[%c0_7, %c0_8] : memref<1x32xf32, #tpu.memory_space<vmem>>, vector<1x32xf32>
    %c0_9 = arith.constant 0 : index
    %c0_10 = arith.constant 0 : index
    %7 = vector.load %arg6[%c0_9, %c0_10] : memref<32x2xf32, #tpu.memory_space<vmem>>, vector<32x2xf32>
    %c0_11 = arith.constant 0 : index
    %c0_12 = arith.constant 0 : index
    %8 = vector.load %arg7[%c0_11, %c0_12] : memref<1x2xf32, #tpu.memory_space<vmem>>, vector<1x2xf32>
    %c0_13 = arith.constant 0 : index
    %c0_14 = arith.constant 0 : index
    %9 = vector.load %arg8[%c0_13, %c0_14] : memref<32x2xf32, #tpu.memory_space<vmem>>, vector<32x2xf32>
    %c0_15 = arith.constant 0 : index
    %c0_16 = arith.constant 0 : index
    %10 = vector.load %arg9[%c0_15, %c0_16] : memref<1x2xf32, #tpu.memory_space<vmem>>, vector<1x2xf32>
    %cst = arith.constant dense<0.000000e+00> : vector<8x32xf32>
    %11 = tpu.matmul %1, %3, %cst {dimension_numbers = #tpu.dot_dimension_numbers<[1], [0], [0], [1], [0, 0, 1, 1], [], []>} : vector<8x2xf32>, vector<2x32xf32>, vector<8x32xf32> -> vector<8x32xf32>
    %12 = vector.broadcast %4 : vector<1x32xf32> to vector<8x32xf32>
    %13 = arith.addf %11, %12 : vector<8x32xf32>
    %cst_17 = arith.constant 0.000000e+00 : f32
    %14 = vector.broadcast %cst_17 : f32 to vector<8x32xf32>
    %15 = arith.cmpf oge, %13, %14 : vector<8x32xf32>
    %cst_18 = arith.constant 0.00999999977 : f32
    %16 = vector.broadcast %cst_18 : f32 to vector<8x32xf32>
    %17 = arith.mulf %16, %13 : vector<8x32xf32>
    %18 = arith.select %15, %13, %17 : vector<8x32xi1>, vector<8x32xf32>
    %cst_19 = arith.constant dense<0.000000e+00> : vector<8x32xf32>
    %19 = tpu.matmul %18, %5, %cst_19 {dimension_numbers = #tpu.dot_dimension_numbers<[1], [0], [0], [1], [0, 0, 1, 1], [], []>} : vector<8x32xf32>, vector<32x32xf32>, vector<8x32xf32> -> vector<8x32xf32>
    %20 = vector.broadcast %6 : vector<1x32xf32> to vector<8x32xf32>
    %21 = arith.addf %19, %20 : vector<8x32xf32>
    %cst_20 = arith.constant 0.000000e+00 : f32
    %22 = vector.broadcast %cst_20 : f32 to vector<8x32xf32>
    %23 = arith.cmpf oge, %21, %22 : vector<8x32xf32>
    %cst_21 = arith.constant 0.00999999977 : f32
    %24 = vector.broadcast %cst_21 : f32 to vector<8x32xf32>
    %25 = arith.mulf %24, %21 : vector<8x32xf32>
    %26 = arith.select %23, %21, %25 : vector<8x32xi1>, vector<8x32xf32>
    %cst_22 = arith.constant dense<0.000000e+00> : vector<8x2xf32>
    %27 = tpu.matmul %26, %7, %cst_22 {dimension_numbers = #tpu.dot_dimension_numbers<[1], [0], [0], [1], [0, 0, 1, 1], [], []>} : vector<8x32xf32>, vector<32x2xf32>, vector<8x2xf32> -> vector<8x2xf32>
    %28 = vector.broadcast %8 : vector<1x2xf32> to vector<8x2xf32>
    %29 = arith.addf %27, %28 : vector<8x2xf32>
    %cst_23 = arith.constant dense<0.000000e+00> : vector<8x2xf32>
    %30 = tpu.matmul %26, %9, %cst_23 {dimension_numbers = #tpu.dot_dimension_numbers<[1], [0], [0], [1], [0, 0, 1, 1], [], []>} : vector<8x32xf32>, vector<32x2xf32>, vector<8x2xf32> -> vector<8x2xf32>
    %31 = vector.broadcast %10 : vector<1x2xf32> to vector<8x2xf32>
    %32 = arith.addf %30, %31 : vector<8x2xf32>
    %33 = math.exp %29 : vector<8x2xf32>
    %34 = arith.mulf %2, %33 : vector<8x2xf32>
    %35 = arith.addf %34, %32 : vector<8x2xf32>
    %c0_24 = arith.constant 0 : index
    %c0_25 = arith.constant 0 : index
    %36 = vector.load %arg10[%c0_24, %c0_25] : memref<2x32xf32, #tpu.memory_space<vmem>>, vector<2x32xf32>
    %c0_26 = arith.constant 0 : index
    %c0_27 = arith.constant 0 : index
    %37 = vector.load %arg11[%c0_26, %c0_27] : memref<1x32xf32, #tpu.memory_space<vmem>>, vector<1x32xf32>
    %c0_28 = arith.constant 0 : index
    %c0_29 = arith.constant 0 : index
    %38 = vector.load %arg12[%c0_28, %c0_29] : memref<32x32xf32, #tpu.memory_space<vmem>>, vector<32x32xf32>
    %c0_30 = arith.constant 0 : index
    %c0_31 = arith.constant 0 : index
    %39 = vector.load %arg13[%c0_30, %c0_31] : memref<1x32xf32, #tpu.memory_space<vmem>>, vector<1x32xf32>
    %c0_32 = arith.constant 0 : index
    %c0_33 = arith.constant 0 : index
    %40 = vector.load %arg14[%c0_32, %c0_33] : memref<32x2xf32, #tpu.memory_space<vmem>>, vector<32x2xf32>
    %c0_34 = arith.constant 0 : index
    %c0_35 = arith.constant 0 : index
    %41 = vector.load %arg15[%c0_34, %c0_35] : memref<1x2xf32, #tpu.memory_space<vmem>>, vector<1x2xf32>
    %c0_36 = arith.constant 0 : index
    %c0_37 = arith.constant 0 : index
    %42 = vector.load %arg16[%c0_36, %c0_37] : memref<32x2xf32, #tpu.memory_space<vmem>>, vector<32x2xf32>
    %c0_38 = arith.constant 0 : index
    %c0_39 = arith.constant 0 : index
    %43 = vector.load %arg17[%c0_38, %c0_39] : memref<1x2xf32, #tpu.memory_space<vmem>>, vector<1x2xf32>
    %cst_40 = arith.constant dense<0.000000e+00> : vector<8x32xf32>
    %44 = tpu.matmul %35, %36, %cst_40 {dimension_numbers = #tpu.dot_dimension_numbers<[1], [0], [0], [1], [0, 0, 1, 1], [], []>} : vector<8x2xf32>, vector<2x32xf32>, vector<8x32xf32> -> vector<8x32xf32>
    %45 = vector.broadcast %37 : vector<1x32xf32> to vector<8x32xf32>
    %46 = arith.addf %44, %45 : vector<8x32xf32>
    %cst_41 = arith.constant 0.000000e+00 : f32
    %47 = vector.broadcast %cst_41 : f32 to vector<8x32xf32>
    %48 = arith.cmpf oge, %46, %47 : vector<8x32xf32>
    %cst_42 = arith.constant 0.00999999977 : f32
    %49 = vector.broadcast %cst_42 : f32 to vector<8x32xf32>
    %50 = arith.mulf %49, %46 : vector<8x32xf32>
    %51 = arith.select %48, %46, %50 : vector<8x32xi1>, vector<8x32xf32>
    %cst_43 = arith.constant dense<0.000000e+00> : vector<8x32xf32>
    %52 = tpu.matmul %51, %38, %cst_43 {dimension_numbers = #tpu.dot_dimension_numbers<[1], [0], [0], [1], [0, 0, 1, 1], [], []>} : vector<8x32xf32>, vector<32x32xf32>, vector<8x32xf32> -> vector<8x32xf32>
    %53 = vector.broadcast %39 : vector<1x32xf32> to vector<8x32xf32>
    %54 = arith.addf %52, %53 : vector<8x32xf32>
    %cst_44 = arith.constant 0.000000e+00 : f32
    %55 = vector.broadcast %cst_44 : f32 to vector<8x32xf32>
    %56 = arith.cmpf oge, %54, %55 : vector<8x32xf32>
    %cst_45 = arith.constant 0.00999999977 : f32
    %57 = vector.broadcast %cst_45 : f32 to vector<8x32xf32>
    %58 = arith.mulf %57, %54 : vector<8x32xf32>
    %59 = arith.select %56, %54, %58 : vector<8x32xi1>, vector<8x32xf32>
    %cst_46 = arith.constant dense<0.000000e+00> : vector<8x2xf32>
    %60 = tpu.matmul %59, %40, %cst_46 {dimension_numbers = #tpu.dot_dimension_numbers<[1], [0], [0], [1], [0, 0, 1, 1], [], []>} : vector<8x32xf32>, vector<32x2xf32>, vector<8x2xf32> -> vector<8x2xf32>
    %61 = vector.broadcast %41 : vector<1x2xf32> to vector<8x2xf32>
    %62 = arith.addf %60, %61 : vector<8x2xf32>
    %cst_47 = arith.constant dense<0.000000e+00> : vector<8x2xf32>
    %63 = tpu.matmul %59, %42, %cst_47 {dimension_numbers = #tpu.dot_dimension_numbers<[1], [0], [0], [1], [0, 0, 1, 1], [], []>} : vector<8x32xf32>, vector<32x2xf32>, vector<8x2xf32> -> vector<8x2xf32>
    %64 = vector.broadcast %43 : vector<1x2xf32> to vector<8x2xf32>
    %65 = arith.addf %63, %64 : vector<8x2xf32>
    %66 = math.exp %62 : vector<8x2xf32>
    %67 = arith.mulf %1, %66 : vector<8x2xf32>
    %68 = arith.addf %67, %65 : vector<8x2xf32>
    %c0_48 = arith.constant 0 : index
    %c0_49 = arith.constant 0 : index
    %69 = vector.load %arg18[%c0_48, %c0_49] : memref<2x32xf32, #tpu.memory_space<vmem>>, vector<2x32xf32>
    %c0_50 = arith.constant 0 : index
    %c0_51 = arith.constant 0 : index
    %70 = vector.load %arg19[%c0_50, %c0_51] : memref<1x32xf32, #tpu.memory_space<vmem>>, vector<1x32xf32>
    %c0_52 = arith.constant 0 : index
    %c0_53 = arith.constant 0 : index
    %71 = vector.load %arg20[%c0_52, %c0_53] : memref<32x32xf32, #tpu.memory_space<vmem>>, vector<32x32xf32>
    %c0_54 = arith.constant 0 : index
    %c0_55 = arith.constant 0 : index
    %72 = vector.load %arg21[%c0_54, %c0_55] : memref<1x32xf32, #tpu.memory_space<vmem>>, vector<1x32xf32>
    %c0_56 = arith.constant 0 : index
    %c0_57 = arith.constant 0 : index
    %73 = vector.load %arg22[%c0_56, %c0_57] : memref<32x2xf32, #tpu.memory_space<vmem>>, vector<32x2xf32>
    %c0_58 = arith.constant 0 : index
    %c0_59 = arith.constant 0 : index
    %74 = vector.load %arg23[%c0_58, %c0_59] : memref<1x2xf32, #tpu.memory_space<vmem>>, vector<1x2xf32>
    %c0_60 = arith.constant 0 : index
    %c0_61 = arith.constant 0 : index
    %75 = vector.load %arg24[%c0_60, %c0_61] : memref<32x2xf32, #tpu.memory_space<vmem>>, vector<32x2xf32>
    %c0_62 = arith.constant 0 : index
    %c0_63 = arith.constant 0 : index
    %76 = vector.load %arg25[%c0_62, %c0_63] : memref<1x2xf32, #tpu.memory_space<vmem>>, vector<1x2xf32>
    %cst_64 = arith.constant dense<0.000000e+00> : vector<8x32xf32>
    %77 = tpu.matmul %68, %69, %cst_64 {dimension_numbers = #tpu.dot_dimension_numbers<[1], [0], [0], [1], [0, 0, 1, 1], [], []>} : vector<8x2xf32>, vector<2x32xf32>, vector<8x32xf32> -> vector<8x32xf32>
    %78 = vector.broadcast %70 : vector<1x32xf32> to vector<8x32xf32>
    %79 = arith.addf %77, %78 : vector<8x32xf32>
    %cst_65 = arith.constant 0.000000e+00 : f32
    %80 = vector.broadcast %cst_65 : f32 to vector<8x32xf32>
    %81 = arith.cmpf oge, %79, %80 : vector<8x32xf32>
    %cst_66 = arith.constant 0.00999999977 : f32
    %82 = vector.broadcast %cst_66 : f32 to vector<8x32xf32>
    %83 = arith.mulf %82, %79 : vector<8x32xf32>
    %84 = arith.select %81, %79, %83 : vector<8x32xi1>, vector<8x32xf32>
    %cst_67 = arith.constant dense<0.000000e+00> : vector<8x32xf32>
    %85 = tpu.matmul %84, %71, %cst_67 {dimension_numbers = #tpu.dot_dimension_numbers<[1], [0], [0], [1], [0, 0, 1, 1], [], []>} : vector<8x32xf32>, vector<32x32xf32>, vector<8x32xf32> -> vector<8x32xf32>
    %86 = vector.broadcast %72 : vector<1x32xf32> to vector<8x32xf32>
    %87 = arith.addf %85, %86 : vector<8x32xf32>
    %cst_68 = arith.constant 0.000000e+00 : f32
    %88 = vector.broadcast %cst_68 : f32 to vector<8x32xf32>
    %89 = arith.cmpf oge, %87, %88 : vector<8x32xf32>
    %cst_69 = arith.constant 0.00999999977 : f32
    %90 = vector.broadcast %cst_69 : f32 to vector<8x32xf32>
    %91 = arith.mulf %90, %87 : vector<8x32xf32>
    %92 = arith.select %89, %87, %91 : vector<8x32xi1>, vector<8x32xf32>
    %cst_70 = arith.constant dense<0.000000e+00> : vector<8x2xf32>
    %93 = tpu.matmul %92, %73, %cst_70 {dimension_numbers = #tpu.dot_dimension_numbers<[1], [0], [0], [1], [0, 0, 1, 1], [], []>} : vector<8x32xf32>, vector<32x2xf32>, vector<8x2xf32> -> vector<8x2xf32>
    %94 = vector.broadcast %74 : vector<1x2xf32> to vector<8x2xf32>
    %95 = arith.addf %93, %94 : vector<8x2xf32>
    %cst_71 = arith.constant dense<0.000000e+00> : vector<8x2xf32>
    %96 = tpu.matmul %92, %75, %cst_71 {dimension_numbers = #tpu.dot_dimension_numbers<[1], [0], [0], [1], [0, 0, 1, 1], [], []>} : vector<8x32xf32>, vector<32x2xf32>, vector<8x2xf32> -> vector<8x2xf32>
    %97 = vector.broadcast %76 : vector<1x2xf32> to vector<8x2xf32>
    %98 = arith.addf %96, %97 : vector<8x2xf32>
    %99 = math.exp %95 : vector<8x2xf32>
    %100 = arith.mulf %35, %99 : vector<8x2xf32>
    %101 = arith.addf %100, %98 : vector<8x2xf32>
    %c0_72 = arith.constant 0 : index
    %c0_73 = arith.constant 0 : index
    %102 = vector.load %arg26[%c0_72, %c0_73] : memref<2x32xf32, #tpu.memory_space<vmem>>, vector<2x32xf32>
    %c0_74 = arith.constant 0 : index
    %c0_75 = arith.constant 0 : index
    %103 = vector.load %arg27[%c0_74, %c0_75] : memref<1x32xf32, #tpu.memory_space<vmem>>, vector<1x32xf32>
    %c0_76 = arith.constant 0 : index
    %c0_77 = arith.constant 0 : index
    %104 = vector.load %arg28[%c0_76, %c0_77] : memref<32x32xf32, #tpu.memory_space<vmem>>, vector<32x32xf32>
    %c0_78 = arith.constant 0 : index
    %c0_79 = arith.constant 0 : index
    %105 = vector.load %arg29[%c0_78, %c0_79] : memref<1x32xf32, #tpu.memory_space<vmem>>, vector<1x32xf32>
    %c0_80 = arith.constant 0 : index
    %c0_81 = arith.constant 0 : index
    %106 = vector.load %arg30[%c0_80, %c0_81] : memref<32x2xf32, #tpu.memory_space<vmem>>, vector<32x2xf32>
    %c0_82 = arith.constant 0 : index
    %c0_83 = arith.constant 0 : index
    %107 = vector.load %arg31[%c0_82, %c0_83] : memref<1x2xf32, #tpu.memory_space<vmem>>, vector<1x2xf32>
    %c0_84 = arith.constant 0 : index
    %c0_85 = arith.constant 0 : index
    %108 = vector.load %arg32[%c0_84, %c0_85] : memref<32x2xf32, #tpu.memory_space<vmem>>, vector<32x2xf32>
    %c0_86 = arith.constant 0 : index
    %c0_87 = arith.constant 0 : index
    %109 = vector.load %arg33[%c0_86, %c0_87] : memref<1x2xf32, #tpu.memory_space<vmem>>, vector<1x2xf32>
    %cst_88 = arith.constant dense<0.000000e+00> : vector<8x32xf32>
    %110 = tpu.matmul %101, %102, %cst_88 {dimension_numbers = #tpu.dot_dimension_numbers<[1], [0], [0], [1], [0, 0, 1, 1], [], []>} : vector<8x2xf32>, vector<2x32xf32>, vector<8x32xf32> -> vector<8x32xf32>
    %111 = vector.broadcast %103 : vector<1x32xf32> to vector<8x32xf32>
    %112 = arith.addf %110, %111 : vector<8x32xf32>
    %cst_89 = arith.constant 0.000000e+00 : f32
    %113 = vector.broadcast %cst_89 : f32 to vector<8x32xf32>
    %114 = arith.cmpf oge, %112, %113 : vector<8x32xf32>
    %cst_90 = arith.constant 0.00999999977 : f32
    %115 = vector.broadcast %cst_90 : f32 to vector<8x32xf32>
    %116 = arith.mulf %115, %112 : vector<8x32xf32>
    %117 = arith.select %114, %112, %116 : vector<8x32xi1>, vector<8x32xf32>
    %cst_91 = arith.constant dense<0.000000e+00> : vector<8x32xf32>
    %118 = tpu.matmul %117, %104, %cst_91 {dimension_numbers = #tpu.dot_dimension_numbers<[1], [0], [0], [1], [0, 0, 1, 1], [], []>} : vector<8x32xf32>, vector<32x32xf32>, vector<8x32xf32> -> vector<8x32xf32>
    %119 = vector.broadcast %105 : vector<1x32xf32> to vector<8x32xf32>
    %120 = arith.addf %118, %119 : vector<8x32xf32>
    %cst_92 = arith.constant 0.000000e+00 : f32
    %121 = vector.broadcast %cst_92 : f32 to vector<8x32xf32>
    %122 = arith.cmpf oge, %120, %121 : vector<8x32xf32>
    %cst_93 = arith.constant 0.00999999977 : f32
    %123 = vector.broadcast %cst_93 : f32 to vector<8x32xf32>
    %124 = arith.mulf %123, %120 : vector<8x32xf32>
    %125 = arith.select %122, %120, %124 : vector<8x32xi1>, vector<8x32xf32>
    %cst_94 = arith.constant dense<0.000000e+00> : vector<8x2xf32>
    %126 = tpu.matmul %125, %106, %cst_94 {dimension_numbers = #tpu.dot_dimension_numbers<[1], [0], [0], [1], [0, 0, 1, 1], [], []>} : vector<8x32xf32>, vector<32x2xf32>, vector<8x2xf32> -> vector<8x2xf32>
    %127 = vector.broadcast %107 : vector<1x2xf32> to vector<8x2xf32>
    %128 = arith.addf %126, %127 : vector<8x2xf32>
    %cst_95 = arith.constant dense<0.000000e+00> : vector<8x2xf32>
    %129 = tpu.matmul %125, %108, %cst_95 {dimension_numbers = #tpu.dot_dimension_numbers<[1], [0], [0], [1], [0, 0, 1, 1], [], []>} : vector<8x32xf32>, vector<32x2xf32>, vector<8x2xf32> -> vector<8x2xf32>
    %130 = vector.broadcast %109 : vector<1x2xf32> to vector<8x2xf32>
    %131 = arith.addf %129, %130 : vector<8x2xf32>
    %132 = math.exp %128 : vector<8x2xf32>
    %133 = arith.mulf %68, %132 : vector<8x2xf32>
    %134 = arith.addf %133, %131 : vector<8x2xf32>
    %135 = tpu.concatenate %134, %101 in 1 : vector<8x2xf32>, vector<8x2xf32> -> vector<8x4xf32>
    %c0_96 = arith.constant 0 : index
    %c0_97 = arith.constant 0 : index
    %136 = vector.load %arg34[%c0_96, %c0_97] : memref<8x4xf32, #tpu.memory_space<vmem>>, vector<8x4xf32>
    tpu.vector_store %arg34[%c0_96, %c0_97], %135 {strides = array<i32>} : memref<8x4xf32, #tpu.memory_space<vmem>>, vector<8x4xf32>,
    return
  }
  func.func @transform_0(%arg0: i32) -> (i32, i32) {
    %c0_i32 = arith.constant 0 : i32
    %c0_i32_0 = arith.constant 0 : i32
    return %arg0, %c0_i32 : i32, i32
  }
  func.func @transform_1(%arg0: i32) -> (i32, i32) {
    %c0_i32 = arith.constant 0 : i32
    %c0_i32_0 = arith.constant 0 : i32
    %c0_i32_1 = arith.constant 0 : i32
    return %c0_i32, %c0_i32_0 : i32, i32
  }
  func.func @transform_2(%arg0: i32) -> (i32, i32) {
    %c0_i32 = arith.constant 0 : i32
    %c0_i32_0 = arith.constant 0 : i32
    %c0_i32_1 = arith.constant 0 : i32
    return %c0_i32, %c0_i32_0 : i32, i32
  }
  func.func @transform_3(%arg0: i32) -> (i32, i32) {
    %c0_i32 = arith.constant 0 : i32
    %c0_i32_0 = arith.constant 0 : i32
    %c0_i32_1 = arith.constant 0 : i32
    return %c0_i32, %c0_i32_0 : i32, i32
  }
  func.func @transform_4(%arg0: i32) -> (i32, i32) {
    %c0_i32 = arith.constant 0 : i32
    %c0_i32_0 = arith.constant 0 : i32
    %c0_i32_1 = arith.constant 0 : i32
    return %c0_i32, %c0_i32_0 : i32, i32
  }
  func.func @transform_5(%arg0: i32) -> (i32, i32) {
    %c0_i32 = arith.constant 0 : i32
    %c0_i32_0 = arith.constant 0 : i32
    %c0_i32_1 = arith.constant 0 : i32
    return %c0_i32, %c0_i32_0 : i32, i32
  }
  func.func @transform_6(%arg0: i32) -> (i32, i32) {
    %c0_i32 = arith.constant 0 : i32
    %c0_i32_0 = arith.constant 0 : i32
    %c0_i32_1 = arith.constant 0 : i32
    return %c0_i32, %c0_i32_0 : i32, i32
  }
  func.func @transform_7(%arg0: i32) -> (i32, i32) {
    %c0_i32 = arith.constant 0 : i32
    %c0_i32_0 = arith.constant 0 : i32
    %c0_i32_1 = arith.constant 0 : i32
    return %c0_i32, %c0_i32_0 : i32, i32
  }
  func.func @transform_8(%arg0: i32) -> (i32, i32) {
    %c0_i32 = arith.constant 0 : i32
    %c0_i32_0 = arith.constant 0 : i32
    %c0_i32_1 = arith.constant 0 : i32
    return %c0_i32, %c0_i32_0 : i32, i32
  }
  func.func @transform_9(%arg0: i32) -> (i32, i32) {
    %c0_i32 = arith.constant 0 : i32
    %c0_i32_0 = arith.constant 0 : i32
    %c0_i32_1 = arith.constant 0 : i32
    return %c0_i32, %c0_i32_0 : i32, i32
  }
  func.func @transform_10(%arg0: i32) -> (i32, i32) {
    %c0_i32 = arith.constant 0 : i32
    %c0_i32_0 = arith.constant 0 : i32
    %c0_i32_1 = arith.constant 0 : i32
    return %c0_i32, %c0_i32_0 : i32, i32
  }
  func.func @transform_11(%arg0: i32) -> (i32, i32) {
    %c0_i32 = arith.constant 0 : i32
    %c0_i32_0 = arith.constant 0 : i32
    %c0_i32_1 = arith.constant 0 : i32
    return %c0_i32, %c0_i32_0 : i32, i32
  }
  func.func @transform_12(%arg0: i32) -> (i32, i32) {
    %c0_i32 = arith.constant 0 : i32
    %c0_i32_0 = arith.constant 0 : i32
    %c0_i32_1 = arith.constant 0 : i32
    return %c0_i32, %c0_i32_0 : i32, i32
  }
  func.func @transform_13(%arg0: i32) -> (i32, i32) {
    %c0_i32 = arith.constant 0 : i32
    %c0_i32_0 = arith.constant 0 : i32
    %c0_i32_1 = arith.constant 0 : i32
    return %c0_i32, %c0_i32_0 : i32, i32
  }
  func.func @transform_14(%arg0: i32) -> (i32, i32) {
    %c0_i32 = arith.constant 0 : i32
    %c0_i32_0 = arith.constant 0 : i32
    %c0_i32_1 = arith.constant 0 : i32
    return %c0_i32, %c0_i32_0 : i32, i32
  }
  func.func @transform_15(%arg0: i32) -> (i32, i32) {
    %c0_i32 = arith.constant 0 : i32
    %c0_i32_0 = arith.constant 0 : i32
    %c0_i32_1 = arith.constant 0 : i32
    return %c0_i32, %c0_i32_0 : i32, i32
  }
  func.func @transform_16(%arg0: i32) -> (i32, i32) {
    %c0_i32 = arith.constant 0 : i32
    %c0_i32_0 = arith.constant 0 : i32
    %c0_i32_1 = arith.constant 0 : i32
    return %c0_i32, %c0_i32_0 : i32, i32
  }
  func.func @transform_17(%arg0: i32) -> (i32, i32) {
    %c0_i32 = arith.constant 0 : i32
    %c0_i32_0 = arith.constant 0 : i32
    %c0_i32_1 = arith.constant 0 : i32
    return %c0_i32, %c0_i32_0 : i32, i32
  }
  func.func @transform_18(%arg0: i32) -> (i32, i32) {
    %c0_i32 = arith.constant 0 : i32
    %c0_i32_0 = arith.constant 0 : i32
    %c0_i32_1 = arith.constant 0 : i32
    return %c0_i32, %c0_i32_0 : i32, i32
  }
  func.func @transform_19(%arg0: i32) -> (i32, i32) {
    %c0_i32 = arith.constant 0 : i32
    %c0_i32_0 = arith.constant 0 : i32
    %c0_i32_1 = arith.constant 0 : i32
    return %c0_i32, %c0_i32_0 : i32, i32
  }
  func.func @transform_20(%arg0: i32) -> (i32, i32) {
    %c0_i32 = arith.constant 0 : i32
    %c0_i32_0 = arith.constant 0 : i32
    %c0_i32_1 = arith.constant 0 : i32
    return %c0_i32, %c0_i32_0 : i32, i32
  }
  func.func @transform_21(%arg0: i32) -> (i32, i32) {
    %c0_i32 = arith.constant 0 : i32
    %c0_i32_0 = arith.constant 0 : i32
    %c0_i32_1 = arith.constant 0 : i32
    return %c0_i32, %c0_i32_0 : i32, i32
  }
  func.func @transform_22(%arg0: i32) -> (i32, i32) {
    %c0_i32 = arith.constant 0 : i32
    %c0_i32_0 = arith.constant 0 : i32
    %c0_i32_1 = arith.constant 0 : i32
    return %c0_i32, %c0_i32_0 : i32, i32
  }
  func.func @transform_23(%arg0: i32) -> (i32, i32) {
    %c0_i32 = arith.constant 0 : i32
    %c0_i32_0 = arith.constant 0 : i32
    %c0_i32_1 = arith.constant 0 : i32
    return %c0_i32, %c0_i32_0 : i32, i32
  }
  func.func @transform_24(%arg0: i32) -> (i32, i32) {
    %c0_i32 = arith.constant 0 : i32
    %c0_i32_0 = arith.constant 0 : i32
    %c0_i32_1 = arith.constant 0 : i32
    return %c0_i32, %c0_i32_0 : i32, i32
  }
  func.func @transform_25(%arg0: i32) -> (i32, i32) {
    %c0_i32 = arith.constant 0 : i32
    %c0_i32_0 = arith.constant 0 : i32
    %c0_i32_1 = arith.constant 0 : i32
    return %c0_i32, %c0_i32_0 : i32, i32
  }
  func.func @transform_26(%arg0: i32) -> (i32, i32) {
    %c0_i32 = arith.constant 0 : i32
    %c0_i32_0 = arith.constant 0 : i32
    %c0_i32_1 = arith.constant 0 : i32
    return %c0_i32, %c0_i32_0 : i32, i32
  }
  func.func @transform_27(%arg0: i32) -> (i32, i32) {
    %c0_i32 = arith.constant 0 : i32
    %c0_i32_0 = arith.constant 0 : i32
    %c0_i32_1 = arith.constant 0 : i32
    return %c0_i32, %c0_i32_0 : i32, i32
  }
  func.func @transform_28(%arg0: i32) -> (i32, i32) {
    %c0_i32 = arith.constant 0 : i32
    %c0_i32_0 = arith.constant 0 : i32
    %c0_i32_1 = arith.constant 0 : i32
    return %c0_i32, %c0_i32_0 : i32, i32
  }
  func.func @transform_29(%arg0: i32) -> (i32, i32) {
    %c0_i32 = arith.constant 0 : i32
    %c0_i32_0 = arith.constant 0 : i32
    %c0_i32_1 = arith.constant 0 : i32
    return %c0_i32, %c0_i32_0 : i32, i32
  }
  func.func @transform_30(%arg0: i32) -> (i32, i32) {
    %c0_i32 = arith.constant 0 : i32
    %c0_i32_0 = arith.constant 0 : i32
    %c0_i32_1 = arith.constant 0 : i32
    return %c0_i32, %c0_i32_0 : i32, i32
  }
  func.func @transform_31(%arg0: i32) -> (i32, i32) {
    %c0_i32 = arith.constant 0 : i32
    %c0_i32_0 = arith.constant 0 : i32
    %c0_i32_1 = arith.constant 0 : i32
    return %c0_i32, %c0_i32_0 : i32, i32
  }
  func.func @transform_32(%arg0: i32) -> (i32, i32) {
    %c0_i32 = arith.constant 0 : i32
    %c0_i32_0 = arith.constant 0 : i32
    %c0_i32_1 = arith.constant 0 : i32
    return %c0_i32, %c0_i32_0 : i32, i32
  }
  func.func @transform_33(%arg0: i32) -> (i32, i32) {
    %c0_i32 = arith.constant 0 : i32
    %c0_i32_0 = arith.constant 0 : i32
    return %arg0, %c0_i32 : i32, i32
  }
}

</mosaic_0001>

<bundles_post_ra>
// kernel: _lambda_.1
= control target key start
LH: loop header
LB: loop body
LE: loop exit
PB: predicated region body
PF: predicated region fallthrough
CT: control target
= control target key end

     0   :  { %s2836_s6 = smov 1   ;;  %s2837_s10 = smov 2   ;;  %s3321_s0 = inlined_call_operand.smem [shape: u32[34], index: -1, kind: input, shape index: {}] }
   0x1   :  { %s2908_s5 = sld [smem:[%s3321_s0]]   ;;  %s2838_s14 = smov 3  }
   0x2   :  { %s2913_s9 = sld [smem:[%s3321_s0 + %s2836_s6]]   ;;  %s2839_s18 = smov 4  }
   0x3   :  { %s2918_s13 = sld [smem:[%s3321_s0 + %s2837_s10]]   ;;  %s2840_s22 = smov 5  }
   0x4   :  { %s2923_s17 = sld [smem:[%s3321_s0 + %s2838_s14]]   ;;  %s2841_s26 = smov 6  }
   0x5   :  { %s2928_s21 = sld [smem:[%s3321_s0 + %s2839_s18]]   ;;  %s2842_s30 = smov 7  }
   0x6   :  { %s2933_s25 = sld [smem:[%s3321_s0 + %s2840_s22]]   ;;  %s2843_s4 = smov 8  }
   0x7   :  { %3334 = sst [smem:[#allocation52_spill]] %s2908_s5  ;;  %s2844_s10 = smov 9  }
   0x8   :  { %s2938_s29 = sld [smem:[%s3321_s0 + %s2841_s26]]   ;;  %s2845_s15 = smov 10  }
   0x9   :  { %s2943_s3 = sld [smem:[%s3321_s0 + %s2842_s30]]   ;;  %s2846_s20 = smov 11  }
   0xa   :  { %s2948_s8 = sld [smem:[%s3321_s0 + %s2843_s4]]   ;;  %s2847_s26 = smov 12  }
   0xb   :  { %s2953_s14 = sld [smem:[%s3321_s0 + %s2844_s10]]   ;;  %s2848_s1 = smov 13  }
   0xc   :  { %s2958_s19 = sld [smem:[%s3321_s0 + %s2845_s15]]   ;;  %s2849_s7 = smov 14  }
   0xd   :  { %s2963_s24 = sld [smem:[%s3321_s0 + %s2846_s20]]   ;;  %s2850_s15 = smov 15  }
   0xe   :  { %s2968_s30 = sld [smem:[%s3321_s0 + %s2847_s26]]   ;;  %s2851_s22 = smov 16  }
   0xf   :  { %3335 = sst [smem:[#allocation53_spill]] %s2943_s3  ;;  %s2852_s28 = smov 17  }
  0x10   :  { %s2973_s6 = sld [smem:[%s3321_s0 + %s2848_s1]]  }
  0x11   :  { %3336 = sst [smem:[#allocation54_spill]] %s2953_s14 }
  0x12   :  { %s2978_s12 = sld [smem:[%s3321_s0 + %s2849_s7]]   ;;  %s2853_s7 = smov 18  }
  0x13   :  { %3337 = sst [smem:[#allocation55_spill]] %s2963_s24 }
  0x14   :  { %s2983_s20 = sld [smem:[%s3321_s0 + %s2850_s15]]   ;;  %s2854_s15 = smov 19  }
  0x15   :  { %s2988_s27 = sld [smem:[%s3321_s0 + %s2851_s22]]   ;;  %s2855_s22 = smov 20  }
  0x16   :  { %3338 = sst [smem:[#allocation56_spill]] %s2973_s6 }
  0x17   :  { %s2993_s4 = sld [smem:[%s3321_s0 + %s2852_s28]]   ;;  %s2856_s28 = smov 21  }
  0x18   :  { %s2998_s5 = sld [smem:[%s3321_s0 + %s2853_s7]]   ;;  %s2857_s7 = smov 22  }
  0x19   :  { %s3008_s6 = sld [smem:[%s3321_s0 + %s2855_s22]]   ;;  %s2859_s22 = smov 24  }
  0x1a   :  { %3339 = sst [smem:[#allocation57_spill]] %s2983_s20 }
  0x1b   :  { %s3003_s20 = sld [smem:[%s3321_s0 + %s2854_s15]]   ;;  %s2858_s15 = smov 23  }
  0x1c   :  { %s3018_s24 = sld [smem:[%s3321_s0 + %s2857_s7]]   ;;  %s2861_s7 = smov 26  }
  0x1d   :  { %3340 = sst [smem:[#allocation58_spill]] %s2993_s4 }
  0x1e   :  { %s3013_s4 = sld [smem:[%s3321_s0 + %s2856_s28]]   ;;  %s2860_s28 = smov 25  }
  0x1f   :  { %s3028_s14 = sld [smem:[%s3321_s0 + %s2859_s22]]   ;;  %s2863_s22 = smov 28  }
  0x20   :  { %s3038_s3 = sld [smem:[%s3321_s0 + %s2861_s7]]   ;;  %s2865_s7 = smov 30  }
  0x21   :  { %3341 = sst [smem:[#allocation59_spill]] %s3003_s20 }
  0x22   :  { %s3023_s20 = sld [smem:[%s3321_s0 + %s2858_s15]]   ;;  %s2862_s15 = smov 27  }
  0x24   :  { %3342 = sst [smem:[#allocation60_spill]] %s3013_s4 }
  0x25   :  { %3344 = sst [smem:[#allocation62_spill]] %s3028_s14 }
  0x26   :  { %s3033_s4 = sld [smem:[%s3321_s0 + %s2860_s28]]   ;;  %s2864_s28 = smov 29  }
  0x27   :  { %3346 = sst [smem:[#allocation64_spill]] %s3038_s3 }
  0x28   :  { %3343 = sst [smem:[#allocation61_spill]] %s3023_s20 }
  0x29   :  { %s3043_s20 = sld [smem:[%s3321_s0 + %s2862_s15]]   ;;  %s2866_s15 = smov 31  }
  0x2a   :  { %s3048_s14 = sld [smem:[%s3321_s0 + %s2863_s22]]   ;;  %s2867_s22 = smov 32  }
  0x2b   :  { %s3058_s3 = sld [smem:[%s3321_s0 + %s2865_s7]]  }
  0x2c   :  { %3345 = sst [smem:[#allocation63_spill]] %s3033_s4 }
  0x2d   :  { %s3053_s4 = sld [smem:[%s3321_s0 + %s2864_s28]]   ;;  %s2868_s28 = smov 33  }
  0x2f   :  { %3347 = sst [smem:[#allocation65_spill]] %s3043_s20 }
  0x30   :  { %3348 = sst [smem:[#allocation66_spill]] %s3048_s14 }
  0x31   :  { %s3063_s20 = sld [smem:[%s3321_s0 + %s2866_s15]]  }
  0x32   :  { %s3068_s14 = sld [smem:[%s3321_s0 + %s2867_s22]]  }
  0x33   :  { %3349 = sst [smem:[#allocation67_spill]] %s3053_s4 }
  0x34   :  { %s3073_s4 = sld [smem:[%s3321_s0 + %s2868_s28]]  }
  0x35   :  { %72 = vsyncpa [#allocation3], 0 }
  0x36   :  { %73 = vsyncpa [#allocation5], 0 }
  0x37   :  { %74 = vsyncpa [#allocation8], 0 }
  0x38   :  { %75 = vsyncpa [#allocation11], 0 }
  0x39   :  { %76 = vsyncpa [#allocation14], 0 }
  0x3a   :  { %77 = vsyncpa [#allocation17], 0 }
  0x3b   :  { %78 = vsyncpa [#allocation20], 0 }
  0x3c   :  { %79 = vsyncpa [#allocation23], 0 }
  0x3d   :  { %80 = vsyncpa [#allocation26], 0 }
  0x3e   :  { %81 = vsyncpa [#allocation29], 0 }
  0x3f   :  { %82 = vsyncpa [#allocation32], 0 }
  0x40   :  { %83 = vsyncpa [#allocation35], 0 }
  0x41   :  { %84 = vsyncpa [#allocation38], 0  ;;  %s2869_s7 = smov [#allocation4]   ;;  %s2870_s0 = smov [#allocation7]  }
  0x42   :  { %s103_s10 = sshll.u32 %s2869_s7, 4  ;;  %s125_s11 = sshll.u32 %s2870_s0, 4  ;;  %s104_s10 = int_to_ptr.vmem [resolvable:$true] %s103_s10  ;;  %s126_s11 = int_to_ptr.vmem [resolvable:$true] %s125_s11 }
  0x43   :  { %s2282_s15 = scalar_lea.hbm %s2918_s13, 16 }
  0x44   :  { %p2283_p0 = scmp.ne.s32.totalorder %s2918_s13, %s2282_s15  ;;  %p2286_p1 = scmp.lt.u32.totalorder %s2282_s15, %s2918_s13 }
  0x46   :  { %p2288_p2 = pnand %p2286_p1, %p2283_p0 }
  0x48   :  { %2291 = shalt.err (!%p2288_p2)
}
  0x49   :  { %s2292_s16 = scalar_lea.vmem %s104_s10, 16  ;;  %s2296_s18 = scalar_lea.vmem %s104_s10, 32 }
  0x4a   :  { %p2293_p3 = scmp.ne.s32.totalorder %s104_s10, %s2292_s16  ;;  %p2297_p4 = scmp.lt.s32.totalorder %s104_s10, %s104_s10 }
  0x4b   :  { %p2298_p5 = scmp.lt.s32.totalorder %s2296_s18, %s2292_s16 }
  0x4d   :  { %p2299_p6 = por %p2298_p5, %p2297_p4 }
  0x4f   :  { %p2300_p7 = pnand %p2299_p6, %p2293_p3 }
  0x51   :  { %2303 = shalt.err (!%p2300_p7)
}
  0x52   :  { %106 = dma.hbm_to_vmem [thread:$0]  %s2918_s13, 16, %s104_s10, [#allocation5]  }
  0x53   :  { %s2304_s22 = scalar_lea.hbm %s2928_s21, 16 }
  0x54   :  { %p2305_p8 = scmp.ne.s32.totalorder %s2928_s21, %s2304_s22  ;;  %p2308_p9 = scmp.lt.u32.totalorder %s2304_s22, %s2928_s21 }
  0x56   :  { %p2310_p10 = pnand %p2308_p9, %p2305_p8 }
  0x58   :  { %2313 = shalt.err (!%p2310_p10)
}
  0x59   :  { %s2314_s23 = scalar_lea.vmem %s126_s11, 16  ;;  %s2318_s26 = scalar_lea.vmem %s126_s11, 32 }
  0x5a   :  { %p2315_p11 = scmp.ne.s32.totalorder %s126_s11, %s2314_s23  ;;  %p2319_p12 = scmp.lt.s32.totalorder %s126_s11, %s126_s11 }
  0x5b   :  { %p2320_p13 = scmp.lt.s32.totalorder %s2318_s26, %s2314_s23 }
  0x5d   :  { %p2321_p0 = por %p2320_p13, %p2319_p12 }
  0x5f   :  { %p2322_p1 = pnand %p2321_p0, %p2315_p11 }
  0x61   :  { %2325 = shalt.err (!%p2322_p1)
}
  0x62   :  { %128 = dma.hbm_to_vmem [thread:$0]  %s2928_s21, 16, %s126_s11, [#allocation8]  }
  0x63   :  { %s2871_s28 = smov [#allocation10]   ;;  %s2872_s1 = smov [#allocation13]  }
  0x64   :  { %s147_s13 = sshll.u32 %s2871_s28, 4  ;;  %s169_s2 = sshll.u32 %s2872_s1, 4  ;;  %s148_s13 = int_to_ptr.vmem [resolvable:$true] %s147_s13  ;;  %s170_s2 = int_to_ptr.vmem [resolvable:$true] %s169_s2 }
  0x65   :  { %s2326_s7 = scalar_lea.hbm %s2938_s29, 16 }
  0x66   :  { %p2327_p2 = scmp.ne.s32.totalorder %s2938_s29, %s2326_s7  ;;  %p2330_p3 = scmp.lt.u32.totalorder %s2326_s7, %s2938_s29 }
  0x68   :  { %p2332_p4 = pnand %p2330_p3, %p2327_p2 }
  0x6a   :  { %2335 = shalt.err (!%p2332_p4)
}
  0x6b   :  { %s2336_s10 = scalar_lea.vmem %s148_s13, 16  ;;  %s2340_s0 = scalar_lea.vmem %s148_s13, 32 }
  0x6c   :  { %p2337_p5 = scmp.ne.s32.totalorder %s148_s13, %s2336_s10  ;;  %p2341_p6 = scmp.lt.s32.totalorder %s148_s13, %s148_s13 }
  0x6d   :  { %p2342_p7 = scmp.lt.s32.totalorder %s2340_s0, %s2336_s10 }
  0x6f   :  { %p2343_p8 = por %p2342_p7, %p2341_p6 }
  0x71   :  { %p2344_p9 = pnand %p2343_p8, %p2337_p5 }
  0x73   :  { %2347 = shalt.err (!%p2344_p9)
}
  0x74   :  { %150 = dma.hbm_to_vmem [thread:$0]  %s2938_s29, 16, %s148_s13, [#allocation11]  }
  0x75   :  { %s2348_s21 = scalar_lea.hbm %s2948_s8, 16 }
  0x76   :  { %p2349_p10 = scmp.ne.s32.totalorder %s2948_s8, %s2348_s21  ;;  %p2352_p11 = scmp.lt.u32.totalorder %s2348_s21, %s2948_s8 }
  0x78   :  { %p2354_p12 = pnand %p2352_p11, %p2349_p10 }
  0x7a   :  { %2357 = shalt.err (!%p2354_p12)
}
  0x7b   :  { %s2358_s11 = scalar_lea.vmem %s170_s2, 16  ;;  %s2362_s15 = scalar_lea.vmem %s170_s2, 32 }
  0x7c   :  { %p2359_p13 = scmp.ne.s32.totalorder %s170_s2, %s2358_s11  ;;  %p2363_p0 = scmp.lt.s32.totalorder %s170_s2, %s170_s2 }
  0x7d   :  { %p2364_p1 = scmp.lt.s32.totalorder %s2362_s15, %s2358_s11 }
  0x7f   :  { %p2365_p2 = por %p2364_p1, %p2363_p0 }
  0x81   :  { %p2366_p3 = pnand %p2365_p2, %p2359_p13 }
  0x83   :  { %2369 = shalt.err (!%p2366_p3)
}
  0x84   :  { %172 = dma.hbm_to_vmem [thread:$0]  %s2948_s8, 16, %s170_s2, [#allocation14]  }
  0x85   :  { %s2873_s16 = smov [#allocation16]   ;;  %s2874_s18 = smov [#allocation19]  }
  0x86   :  { %s189_s29 = sshll.u32 %s2873_s16, 4  ;;  %s211_s22 = sshll.u32 %s2874_s18, 4  ;;  %s190_s29 = int_to_ptr.vmem [resolvable:$true] %s189_s29  ;;  %s212_s22 = int_to_ptr.vmem [resolvable:$true] %s211_s22 }
  0x87   :  { %s2370_s23 = scalar_lea.hbm %s2958_s19, 16 }
  0x88   :  { %p2371_p4 = scmp.ne.s32.totalorder %s2958_s19, %s2370_s23  ;;  %p2374_p5 = scmp.lt.u32.totalorder %s2370_s23, %s2958_s19 }
  0x8a   :  { %p2376_p6 = pnand %p2374_p5, %p2371_p4 }
  0x8c   :  { %2379 = shalt.err (!%p2376_p6)
}
  0x8d   :  { %s2380_s26 = scalar_lea.vmem %s190_s29, 16  ;;  %s2384_s28 = scalar_lea.vmem %s190_s29, 32 }
  0x8e   :  { %p2381_p7 = scmp.ne.s32.totalorder %s190_s29, %s2380_s26  ;;  %p2385_p8 = scmp.lt.s32.totalorder %s190_s29, %s190_s29 }
  0x8f   :  { %p2386_p9 = scmp.lt.s32.totalorder %s2384_s28, %s2380_s26 }
  0x91   :  { %p2387_p10 = por %p2386_p9, %p2385_p8 }
  0x93   :  { %p2388_p11 = pnand %p2387_p10, %p2381_p7 }
  0x95   :  { %2391 = shalt.err (!%p2388_p11)
}
  0x96   :  { %192 = dma.hbm_to_vmem [thread:$0]  %s2958_s19, 16, %s190_s29, [#allocation17]  }
  0x97   :  { %s2392_s8 = scalar_lea.hbm %s2968_s30, 16 }
  0x98   :  { %p2393_p12 = scmp.ne.s32.totalorder %s2968_s30, %s2392_s8  ;;  %p2396_p13 = scmp.lt.u32.totalorder %s2392_s8, %s2968_s30 }
  0x9a   :  { %p2398_p0 = pnand %p2396_p13, %p2393_p12 }
  0x9c   :  { %2401 = shalt.err (!%p2398_p0)
}
  0x9d   :  { %s2402_s13 = scalar_lea.vmem %s212_s22, 16  ;;  %s2406_s1 = scalar_lea.vmem %s212_s22, 32 }
  0x9e   :  { %p2403_p1 = scmp.ne.s32.totalorder %s212_s22, %s2402_s13  ;;  %p2407_p2 = scmp.lt.s32.totalorder %s212_s22, %s212_s22 }
  0x9f   :  { %p2408_p3 = scmp.lt.s32.totalorder %s2406_s1, %s2402_s13 }
  0xa1   :  { %p2409_p4 = por %p2408_p3, %p2407_p2 }
  0xa3   :  { %p2410_p5 = pnand %p2409_p4, %p2403_p1 }
  0xa5   :  { %2413 = shalt.err (!%p2410_p5)
}
  0xa6   :  { %214 = dma.hbm_to_vmem [thread:$0]  %s2968_s30, 16, %s212_s22, [#allocation20]  }
  0xa7   :  { %s2875_s2 = smov [#allocation22]   ;;  %s2876_s7 = smov [#allocation25]  }
  0xa8   :  { %s233_s19 = sshll.u32 %s2875_s2, 4  ;;  %s255_s10 = sshll.u32 %s2876_s7, 4  ;;  %s234_s19 = int_to_ptr.vmem [resolvable:$true] %s233_s19  ;;  %s256_s10 = int_to_ptr.vmem [resolvable:$true] %s255_s10 }
  0xa9   :  { %s2414_s0 = scalar_lea.hbm %s2978_s12, 16 }
  0xaa   :  { %p2415_p6 = scmp.ne.s32.totalorder %s2978_s12, %s2414_s0  ;;  %p2418_p7 = scmp.lt.u32.totalorder %s2414_s0, %s2978_s12 }
  0xac   :  { %p2420_p8 = pnand %p2418_p7, %p2415_p6 }
  0xae   :  { %2423 = shalt.err (!%p2420_p8)
}
  0xaf   :  { %s2424_s21 = scalar_lea.vmem %s234_s19, 16  ;;  %s2428_s11 = scalar_lea.vmem %s234_s19, 32 }
  0xb0   :  { %p2425_p9 = scmp.ne.s32.totalorder %s234_s19, %s2424_s21  ;;  %p2429_p10 = scmp.lt.s32.totalorder %s234_s19, %s234_s19 }
  0xb1   :  { %p2430_p11 = scmp.lt.s32.totalorder %s2428_s11, %s2424_s21 }
  0xb3   :  { %p2431_p12 = por %p2430_p11, %p2429_p10 }
  0xb5   :  { %p2432_p13 = pnand %p2431_p12, %p2425_p9 }
  0xb7   :  { %2435 = shalt.err (!%p2432_p13)
}
  0xb8   :  { %236 = dma.hbm_to_vmem [thread:$0]  %s2978_s12, 16, %s234_s19, [#allocation23]  }
  0xb9   :  { %s2436_s30 = scalar_lea.hbm %s2988_s27, 16 }
  0xba   :  { %p2437_p0 = scmp.ne.s32.totalorder %s2988_s27, %s2436_s30  ;;  %p2440_p1 = scmp.lt.u32.totalorder %s2436_s30, %s2988_s27 }
  0xbc   :  { %p2442_p2 = pnand %p2440_p1, %p2437_p0 }
  0xbe   :  { %2445 = shalt.err (!%p2442_p2)
}
  0xbf   :  { %s2446_s15 = scalar_lea.vmem %s256_s10, 16  ;;  %s2450_s16 = scalar_lea.vmem %s256_s10, 32 }
  0xc0   :  { %p2447_p3 = scmp.ne.s32.totalorder %s256_s10, %s2446_s15  ;;  %p2451_p4 = scmp.lt.s32.totalorder %s256_s10, %s256_s10 }
  0xc1   :  { %p2452_p5 = scmp.lt.s32.totalorder %s2450_s16, %s2446_s15 }
  0xc3   :  { %p2453_p6 = por %p2452_p5, %p2451_p4 }
  0xc5   :  { %p2454_p7 = pnand %p2453_p6, %p2447_p3 }
  0xc7   :  { %2457 = shalt.err (!%p2454_p7)
}
  0xc8   :  { %258 = dma.hbm_to_vmem [thread:$0]  %s2988_s27, 16, %s256_s10, [#allocation26]  }
  0xc9   :  { %s2877_s29 = smov [#allocation28]   ;;  %s2878_s18 = smov [#allocation31]  }
  0xca   :  { %s275_s12 = sshll.u32 %s2877_s29, 4  ;;  %s297_s22 = sshll.u32 %s2878_s18, 4  ;;  %s276_s12 = int_to_ptr.vmem [resolvable:$true] %s275_s12  ;;  %s298_s22 = int_to_ptr.vmem [resolvable:$true] %s297_s22 }
  0xcb   :  { %s2458_s23 = scalar_lea.hbm %s2998_s5, 16 }
  0xcc   :  { %p2459_p8 = scmp.ne.s32.totalorder %s2998_s5, %s2458_s23  ;;  %p2462_p9 = scmp.lt.u32.totalorder %s2458_s23, %s2998_s5 }
  0xce   :  { %p2464_p10 = pnand %p2462_p9, %p2459_p8 }
  0xd0   :  { %2467 = shalt.err (!%p2464_p10)
}
  0xd1   :  { %s2468_s26 = scalar_lea.vmem %s276_s12, 16  ;;  %s2472_s28 = scalar_lea.vmem %s276_s12, 32 }
  0xd2   :  { %p2469_p11 = scmp.ne.s32.totalorder %s276_s12, %s2468_s26  ;;  %p2473_p12 = scmp.lt.s32.totalorder %s276_s12, %s276_s12 }
  0xd3   :  { %p2474_p13 = scmp.lt.s32.totalorder %s2472_s28, %s2468_s26 }
  0xd5   :  { %p2475_p0 = por %p2474_p13, %p2473_p12 }
  0xd7   :  { %p2476_p1 = pnand %p2475_p0, %p2469_p11 }
  0xd9   :  { %2479 = shalt.err (!%p2476_p1)
}
  0xda   :  { %278 = dma.hbm_to_vmem [thread:$0]  %s2998_s5, 16, %s276_s12, [#allocation29]  }
  0xdb   :  { %s2480_s27 = scalar_lea.hbm %s3008_s6, 16 }
  0xdc   :  { %p2481_p2 = scmp.ne.s32.totalorder %s3008_s6, %s2480_s27  ;;  %p2484_p3 = scmp.lt.u32.totalorder %s2480_s27, %s3008_s6 }
  0xde   :  { %p2486_p4 = pnand %p2484_p3, %p2481_p2 }
  0xe0   :  { %2489 = shalt.err (!%p2486_p4)
}
  0xe1   :  { %s2490_s8 = scalar_lea.vmem %s298_s22, 16  ;;  %s2494_s13 = scalar_lea.vmem %s298_s22, 32 }
  0xe2   :  { %p2491_p5 = scmp.ne.s32.totalorder %s298_s22, %s2490_s8  ;;  %p2495_p6 = scmp.lt.s32.totalorder %s298_s22, %s298_s22 }
  0xe3   :  { %p2496_p7 = scmp.lt.s32.totalorder %s2494_s13, %s2490_s8 }
  0xe5   :  { %p2497_p8 = por %p2496_p7, %p2495_p6 }
  0xe7   :  { %p2498_p9 = pnand %p2497_p8, %p2491_p5 }
  0xe9   :  { %2501 = shalt.err (!%p2498_p9)
}
  0xea   :  { %300 = dma.hbm_to_vmem [thread:$0]  %s3008_s6, 16, %s298_s22, [#allocation32]  }
  0xeb   :  { %s2879_s1 = smov [#allocation34]   ;;  %s2880_s2 = smov [#allocation2]  }
  0xec   :  { %s319_s5 = sshll.u32 %s2879_s1, 4  ;;  %s93_s19 = sshll.u32 %s2880_s2, 4  ;;  %s320_s5 = int_to_ptr.vmem [resolvable:$true] %s319_s5  ;;  %s94_s19 = int_to_ptr.vmem [resolvable:$true] %s93_s19 }
  0xed   :  { %s2502_s7 = scalar_lea.hbm %s3018_s24, 16 }
  0xee   :  { %p2503_p10 = scmp.ne.s32.totalorder %s3018_s24, %s2502_s7  ;;  %p2506_p11 = scmp.lt.u32.totalorder %s2502_s7, %s3018_s24 }
  0xf0   :  { %p2508_p12 = pnand %p2506_p11, %p2503_p10 }
  0xf2   :  { %2511 = shalt.err (!%p2508_p12)
}
  0xf3   :  { %s2512_s10 = scalar_lea.vmem %s320_s5, 16  ;;  %s2516_s0 = scalar_lea.vmem %s320_s5, 32 }
  0xf4   :  { %p2513_p13 = scmp.ne.s32.totalorder %s320_s5, %s2512_s10  ;;  %p2517_p0 = scmp.lt.s32.totalorder %s320_s5, %s320_s5 }
  0xf5   :  { %p2518_p1 = scmp.lt.s32.totalorder %s2516_s0, %s2512_s10 }
  0xf7   :  { %p2519_p2 = por %p2518_p1, %p2517_p0 }
  0xf9   :  { %p2520_p3 = pnand %p2519_p2, %p2513_p13 }
  0xfb   :  { %2523 = shalt.err (!%p2520_p3)
}
  0xfc   :  { %322 = dma.hbm_to_vmem [thread:$0]  %s3018_s24, 16, %s320_s5, [#allocation35]  }
  0xfd   :  { %s2524_s6 = scalar_lea.hbm %s2913_s9, 32 }
  0xfe   :  { %p2525_p4 = scmp.ne.s32.totalorder %s2913_s9, %s2524_s6  ;;  %p2528_p5 = scmp.lt.u32.totalorder %s2524_s6, %s2913_s9 }
 0x100   :  { %p2530_p6 = pnand %p2528_p5, %p2525_p4 }
 0x102   :  { %2533 = shalt.err (!%p2530_p6)
}
 0x103   :  { %s2534_s21 = scalar_lea.vmem %s94_s19, 32  ;;  %p2539_p8 = scmp.lt.s32.totalorder %s94_s19, %s94_s19 }
 0x104   :  { %p2535_p7 = scmp.ne.s32.totalorder %s94_s19, %s2534_s21  ;;  %p2540_p9 = scmp.lt.s32.totalorder %s2534_s21, %s2534_s21 }
 0x106   :  { %p2541_p10 = por %p2540_p9, %p2539_p8 }
 0x108   :  { %p2542_p11 = pnand %p2541_p10, %p2535_p7 }
 0x10a   :  { %2545 = shalt.err (!%p2542_p11)
}
 0x10b   :  { %96 = dma.hbm_to_vmem [thread:$0]  %s2913_s9, 32, %s94_s19, [#allocation3]  }
 0x10c   :  { %s2881_s11 = smov [#allocation6]   ;;  %s2546_s24 = scalar_lea.hbm %s2923_s17, 512 }
 0x10d   :  { %s112_s30 = sshll.u32 %s2881_s11, 4  ;;  %p2547_p12 = scmp.ne.s32.totalorder %s2923_s17, %s2546_s24  ;;  %s113_s30 = int_to_ptr.vmem [resolvable:$true] %s112_s30 }
 0x10e   :  { %p2550_p13 = scmp.lt.u32.totalorder %s2546_s24, %s2923_s17 }
 0x110   :  { %p2552_p0 = pnand %p2550_p13, %p2547_p12 }
 0x112   :  { %2555 = shalt.err (!%p2552_p0)
}
 0x113   :  { %s2556_s15 = scalar_lea.vmem %s113_s30, 512  ;;  %p2561_p2 = scmp.lt.s32.totalorder %s113_s30, %s113_s30 }
 0x114   :  { %p2557_p1 = scmp.ne.s32.totalorder %s113_s30, %s2556_s15  ;;  %p2562_p3 = scmp.lt.s32.totalorder %s2556_s15, %s2556_s15 }
 0x116   :  { %p2563_p4 = por %p2562_p3, %p2561_p2 }
 0x118   :  { %p2564_p5 = pnand %p2563_p4, %p2557_p1 }
 0x11a   :  { %2567 = shalt.err (!%p2564_p5)
}
 0x11b   :  { %s2882_s16 = smov 128   ;;  %s2883_s9 = smov 8  }
 0x11c   :  { %118 = dma.hbm_to_vmem [thread:$0]  %s2923_s17, 512, %s113_s30, [#allocation5], %s2882_s16, %s2882_s16, %s2883_s9  }
 0x11d   :  { %s2884_s29 = smov [#allocation9]   ;;  %s2885_s18 = smov [#allocation12]  }
 0x11e   :  { %s134_s12 = sshll.u32 %s2884_s29, 4  ;;  %s156_s22 = sshll.u32 %s2885_s18, 4  ;;  %s135_s12 = int_to_ptr.vmem [resolvable:$true] %s134_s12  ;;  %s157_s22 = int_to_ptr.vmem [resolvable:$true] %s156_s22 }
 0x11f   :  { %s2568_s23 = scalar_lea.hbm %s2933_s25, 512 }
 0x120   :  { %p2569_p6 = scmp.ne.s32.totalorder %s2933_s25, %s2568_s23  ;;  %p2572_p7 = scmp.lt.u32.totalorder %s2568_s23, %s2933_s25 }
 0x122   :  { %p2574_p8 = pnand %p2572_p7, %p2569_p6 }
 0x124   :  { %2577 = shalt.err (!%p2574_p8)
}
 0x125   :  { %s2578_s26 = scalar_lea.vmem %s135_s12, 512  ;;  %p2583_p10 = scmp.lt.s32.totalorder %s135_s12, %s135_s12 }
 0x126   :  { %p2579_p9 = scmp.ne.s32.totalorder %s135_s12, %s2578_s26  ;;  %p2584_p11 = scmp.lt.s32.totalorder %s2578_s26, %s2578_s26 }
 0x128   :  { %p2585_p12 = por %p2584_p11, %p2583_p10 }
 0x12a   :  { %p2586_p13 = pnand %p2585_p12, %p2579_p9 }
 0x12c   :  { %2589 = shalt.err (!%p2586_p13)
}
 0x12d   :  { %s3350_s17 = sld [smem:[#allocation53_spill]] }
 0x12e   :  { %140 = dma.hbm_to_vmem [thread:$0]  %s2933_s25, 512, %s135_s12, [#allocation8], %s2882_s16, %s2882_s16, %s2883_s9  }
 0x133   :  { %s2590_s28 = scalar_lea.hbm %s3350_s17, 512 }
 0x134   :  { %p2591_p0 = scmp.ne.s32.totalorder %s3350_s17, %s2590_s28  ;;  %p2594_p1 = scmp.lt.u32.totalorder %s2590_s28, %s3350_s17 }
 0x136   :  { %p2596_p2 = pnand %p2594_p1, %p2591_p0 }
 0x138   :  { %2599 = shalt.err (!%p2596_p2)
}
 0x139   :  { %s2600_s27 = scalar_lea.vmem %s157_s22, 512  ;;  %p2605_p4 = scmp.lt.s32.totalorder %s157_s22, %s157_s22 }
 0x13a   :  { %p2601_p3 = scmp.ne.s32.totalorder %s157_s22, %s2600_s27  ;;  %p2606_p5 = scmp.lt.s32.totalorder %s2600_s27, %s2600_s27 }
 0x13c   :  { %p2607_p6 = por %p2606_p5, %p2605_p4 }
 0x13e   :  { %p2608_p7 = pnand %p2607_p6, %p2601_p3 }
 0x140   :  { %2611 = shalt.err (!%p2608_p7)
}
 0x141   :  { %s3351_s8 = sld [smem:[#allocation54_spill]]  ;;  %s2886_s25 = smov [#allocation15]  }
 0x142   :  { %162 = dma.hbm_to_vmem [thread:$0]  %s3350_s17, 512, %s157_s22, [#allocation11], %s2882_s16, %s2882_s16, %s2883_s9  }
 0x143   :  { %s179_s13 = sshll.u32 %s2886_s25, 4  ;;  %s2887_s1 = smov [#allocation18]   ;;  %s180_s13 = int_to_ptr.vmem [resolvable:$true] %s179_s13 }
 0x144   :  { %s198_s5 = sshll.u32 %s2887_s1, 4  ;;  %s199_s5 = int_to_ptr.vmem [resolvable:$true] %s198_s5 }
 0x147   :  { %s2612_s2 = scalar_lea.hbm %s3351_s8, 32 }
 0x148   :  { %p2613_p8 = scmp.ne.s32.totalorder %s3351_s8, %s2612_s2  ;;  %p2616_p9 = scmp.lt.u32.totalorder %s2612_s2, %s3351_s8 }
 0x14a   :  { %p2618_p10 = pnand %p2616_p9, %p2613_p8 }
 0x14c   :  { %2621 = shalt.err (!%p2618_p10)
}
 0x14d   :  { %s2622_s19 = scalar_lea.vmem %s180_s13, 32  ;;  %p2627_p12 = scmp.lt.s32.totalorder %s180_s13, %s180_s13 }
 0x14e   :  { %p2623_p11 = scmp.ne.s32.totalorder %s180_s13, %s2622_s19  ;;  %p2628_p13 = scmp.lt.s32.totalorder %s2622_s19, %s2622_s19 }
 0x150   :  { %p2629_p0 = por %p2628_p13, %p2627_p12 }
 0x152   :  { %p2630_p1 = pnand %p2629_p0, %p2623_p11 }
 0x154   :  { %2633 = shalt.err (!%p2630_p1)
}
 0x155   :  { %s3352_s7 = sld [smem:[#allocation55_spill]] }
 0x156   :  { %182 = dma.hbm_to_vmem [thread:$0]  %s3351_s8, 32, %s180_s13, [#allocation14]  }
 0x15b   :  { %s2634_s10 = scalar_lea.hbm %s3352_s7, 512 }
 0x15c   :  { %p2635_p2 = scmp.ne.s32.totalorder %s3352_s7, %s2634_s10  ;;  %p2638_p3 = scmp.lt.u32.totalorder %s2634_s10, %s3352_s7 }
 0x15e   :  { %p2640_p4 = pnand %p2638_p3, %p2635_p2 }
 0x160   :  { %2643 = shalt.err (!%p2640_p4)
}
 0x161   :  { %s2644_s0 = scalar_lea.vmem %s199_s5, 512  ;;  %p2649_p6 = scmp.lt.s32.totalorder %s199_s5, %s199_s5 }
 0x162   :  { %p2645_p5 = scmp.ne.s32.totalorder %s199_s5, %s2644_s0  ;;  %p2650_p7 = scmp.lt.s32.totalorder %s2644_s0, %s2644_s0 }
 0x164   :  { %p2651_p8 = por %p2650_p7, %p2649_p6 }
 0x166   :  { %p2652_p9 = pnand %p2651_p8, %p2645_p5 }
 0x168   :  { %2655 = shalt.err (!%p2652_p9)
}
 0x169   :  { %s3353_s6 = sld [smem:[#allocation56_spill]]  ;;  %s2888_s21 = smov [#allocation21]  }
 0x16a   :  { %204 = dma.hbm_to_vmem [thread:$0]  %s3352_s7, 512, %s199_s5, [#allocation17], %s2882_s16, %s2882_s16, %s2883_s9  }
 0x16b   :  { %s220_s11 = sshll.u32 %s2888_s21, 4  ;;  %s2889_s30 = smov [#allocation24]   ;;  %s221_s11 = int_to_ptr.vmem [resolvable:$true] %s220_s11 }
 0x16c   :  { %s242_s24 = sshll.u32 %s2889_s30, 4  ;;  %s243_s24 = int_to_ptr.vmem [resolvable:$true] %s242_s24 }
 0x16f   :  { %s2656_s15 = scalar_lea.hbm %s3353_s6, 512 }
 0x170   :  { %p2657_p10 = scmp.ne.s32.totalorder %s3353_s6, %s2656_s15  ;;  %p2660_p11 = scmp.lt.u32.totalorder %s2656_s15, %s3353_s6 }
 0x172   :  { %p2662_p12 = pnand %p2660_p11, %p2657_p10 }
 0x174   :  { %2665 = shalt.err (!%p2662_p12)
}
 0x175   :  { %s2666_s29 = scalar_lea.vmem %s221_s11, 512  ;;  %p2671_p0 = scmp.lt.s32.totalorder %s221_s11, %s221_s11 }
 0x176   :  { %p2667_p13 = scmp.ne.s32.totalorder %s221_s11, %s2666_s29  ;;  %p2672_p1 = scmp.lt.s32.totalorder %s2666_s29, %s2666_s29 }
 0x178   :  { %p2673_p2 = por %p2672_p1, %p2671_p0 }
 0x17a   :  { %p2674_p3 = pnand %p2673_p2, %p2667_p13 }
 0x17c   :  { %2677 = shalt.err (!%p2674_p3)
}
 0x17d   :  { %s3354_s12 = sld [smem:[#allocation57_spill]] }
 0x17e   :  { %226 = dma.hbm_to_vmem [thread:$0]  %s3353_s6, 512, %s221_s11, [#allocation20], %s2882_s16, %s2882_s16, %s2883_s9  }
 0x183   :  { %s2678_s18 = scalar_lea.hbm %s3354_s12, 512 }
 0x184   :  { %p2679_p4 = scmp.ne.s32.totalorder %s3354_s12, %s2678_s18  ;;  %p2682_p5 = scmp.lt.u32.totalorder %s2678_s18, %s3354_s12 }
 0x186   :  { %p2684_p6 = pnand %p2682_p5, %p2679_p4 }
 0x188   :  { %2687 = shalt.err (!%p2684_p6)
}
 0x189   :  { %s2688_s22 = scalar_lea.vmem %s243_s24, 512  ;;  %p2693_p8 = scmp.lt.s32.totalorder %s243_s24, %s243_s24 }
 0x18a   :  { %p2689_p7 = scmp.ne.s32.totalorder %s243_s24, %s2688_s22  ;;  %p2694_p9 = scmp.lt.s32.totalorder %s2688_s22, %s2688_s22 }
 0x18c   :  { %p2695_p10 = por %p2694_p9, %p2693_p8 }
 0x18e   :  { %p2696_p11 = pnand %p2695_p10, %p2689_p7 }
 0x190   :  { %2699 = shalt.err (!%p2696_p11)
}
 0x191   :  { %s3355_s23 = sld [smem:[#allocation58_spill]]  ;;  %s2890_s26 = smov [#allocation27]  }
 0x192   :  { %248 = dma.hbm_to_vmem [thread:$0]  %s3354_s12, 512, %s243_s24, [#allocation23], %s2882_s16, %s2882_s16, %s2883_s9  }
 0x193   :  { %s265_s17 = sshll.u32 %s2890_s26, 4  ;;  %s2891_s28 = smov [#allocation30]   ;;  %s266_s17 = int_to_ptr.vmem [resolvable:$true] %s265_s17 }
 0x194   :  { %s284_s27 = sshll.u32 %s2891_s28, 4  ;;  %s285_s27 = int_to_ptr.vmem [resolvable:$true] %s284_s27 }
 0x197   :  { %s2700_s8 = scalar_lea.hbm %s3355_s23, 32 }
 0x198   :  { %p2701_p12 = scmp.ne.s32.totalorder %s3355_s23, %s2700_s8  ;;  %p2704_p13 = scmp.lt.u32.totalorder %s2700_s8, %s3355_s23 }
 0x19a   :  { %p2706_p0 = pnand %p2704_p13, %p2701_p12 }
 0x19c   :  { %2709 = shalt.err (!%p2706_p0)
}
 0x19d   :  { %s2710_s25 = scalar_lea.vmem %s266_s17, 32  ;;  %p2715_p2 = scmp.lt.s32.totalorder %s266_s17, %s266_s17 }
 0x19e   :  { %p2711_p1 = scmp.ne.s32.totalorder %s266_s17, %s2710_s25  ;;  %p2716_p3 = scmp.lt.s32.totalorder %s2710_s25, %s2710_s25 }
 0x1a0   :  { %p2717_p4 = por %p2716_p3, %p2715_p2 }
 0x1a2   :  { %p2718_p5 = pnand %p2717_p4, %p2711_p1 }
 0x1a4   :  { %2721 = shalt.err (!%p2718_p5)
}
 0x1a5   :  { %s3356_s13 = sld [smem:[#allocation59_spill]] }
 0x1a6   :  { %268 = dma.hbm_to_vmem [thread:$0]  %s3355_s23, 32, %s266_s17, [#allocation26]  }
 0x1ab   :  { %s2722_s1 = scalar_lea.hbm %s3356_s13, 512 }
 0x1ac   :  { %p2723_p6 = scmp.ne.s32.totalorder %s3356_s13, %s2722_s1  ;;  %p2726_p7 = scmp.lt.u32.totalorder %s2722_s1, %s3356_s13 }
 0x1ae   :  { %p2728_p8 = pnand %p2726_p7, %p2723_p6 }
 0x1b0   :  { %2731 = shalt.err (!%p2728_p8)
}
 0x1b1   :  { %s2732_s5 = scalar_lea.vmem %s285_s27, 512  ;;  %p2737_p10 = scmp.lt.s32.totalorder %s285_s27, %s285_s27 }
 0x1b2   :  { %p2733_p9 = scmp.ne.s32.totalorder %s285_s27, %s2732_s5  ;;  %p2738_p11 = scmp.lt.s32.totalorder %s2732_s5, %s2732_s5 }
 0x1b4   :  { %p2739_p12 = por %p2738_p11, %p2737_p10 }
 0x1b6   :  { %p2740_p13 = pnand %p2739_p12, %p2733_p9 }
 0x1b8   :  { %2743 = shalt.err (!%p2740_p13)
}
 0x1b9   :  { %s3357_s2 = sld [smem:[#allocation60_spill]]  ;;  %s2892_s19 = smov [#allocation33]  }
 0x1ba   :  { %290 = dma.hbm_to_vmem [thread:$0]  %s3356_s13, 512, %s285_s27, [#allocation29], %s2882_s16, %s2882_s16, %s2883_s9  }
 0x1bb   :  { %s306_s7 = sshll.u32 %s2892_s19, 4  ;;  %s2893_s10 = smov [#allocation36]   ;;  %s307_s7 = int_to_ptr.vmem [resolvable:$true] %s306_s7 }
 0x1bc   :  { %s328_s0 = sshll.u32 %s2893_s10, 4  ;;  %s329_s0 = int_to_ptr.vmem [resolvable:$true] %s328_s0 }
 0x1bf   :  { %s2744_s6 = scalar_lea.hbm %s3357_s2, 512 }
 0x1c0   :  { %p2745_p0 = scmp.ne.s32.totalorder %s3357_s2, %s2744_s6  ;;  %p2748_p1 = scmp.lt.u32.totalorder %s2744_s6, %s3357_s2 }
 0x1c2   :  { %p2750_p2 = pnand %p2748_p1, %p2745_p0 }
 0x1c4   :  { %2753 = shalt.err (!%p2750_p2)
}
 0x1c5   :  { %s2754_s21 = scalar_lea.vmem %s307_s7, 512  ;;  %p2759_p4 = scmp.lt.s32.totalorder %s307_s7, %s307_s7 }
 0x1c6   :  { %p2755_p3 = scmp.ne.s32.totalorder %s307_s7, %s2754_s21  ;;  %p2760_p5 = scmp.lt.s32.totalorder %s2754_s21, %s2754_s21 }
 0x1c8   :  { %p2761_p6 = por %p2760_p5, %p2759_p4 }
 0x1ca   :  { %p2762_p7 = pnand %p2761_p6, %p2755_p3 }
 0x1cc   :  { %2765 = shalt.err (!%p2762_p7)
}
 0x1cd   :  { %s3358_s11 = sld [smem:[#allocation61_spill]] }
 0x1ce   :  { %312 = dma.hbm_to_vmem [thread:$0]  %s3357_s2, 512, %s307_s7, [#allocation32], %s2882_s16, %s2882_s16, %s2883_s9  }
 0x1d3   :  { %s2766_s30 = scalar_lea.hbm %s3358_s11, 512 }
 0x1d4   :  { %p2767_p8 = scmp.ne.s32.totalorder %s3358_s11, %s2766_s30  ;;  %p2770_p9 = scmp.lt.u32.totalorder %s2766_s30, %s3358_s11 }
 0x1d6   :  { %p2772_p10 = pnand %p2770_p9, %p2767_p8 }
 0x1d8   :  { %2775 = shalt.err (!%p2772_p10)
}
 0x1d9   :  { %s2776_s24 = scalar_lea.vmem %s329_s0, 512  ;;  %p2781_p12 = scmp.lt.s32.totalorder %s329_s0, %s329_s0 }
 0x1da   :  { %p2777_p11 = scmp.ne.s32.totalorder %s329_s0, %s2776_s24  ;;  %p2782_p13 = scmp.lt.s32.totalorder %s2776_s24, %s2776_s24 }
 0x1dc   :  { %p2783_p0 = por %p2782_p13, %p2781_p12 }
 0x1de   :  { %p2784_p1 = pnand %p2783_p0, %p2777_p11 }
 0x1e0   :  { %2787 = shalt.err (!%p2784_p1)
}
 0x1e1   :  { %s3359_s15 = sld [smem:[#allocation62_spill]]  ;;  %s2894_s29 = smov [#allocation37]  }
 0x1e2   :  { %334 = dma.hbm_to_vmem [thread:$0]  %s3358_s11, 512, %s329_s0, [#allocation35], %s2882_s16, %s2882_s16, %s2883_s9  }
 0x1e3   :  { %s341_s12 = sshll.u32 %s2894_s29, 4  ;;  %s342_s12 = int_to_ptr.vmem [resolvable:$true] %s341_s12 }
 0x1e7   :  { %s2788_s18 = scalar_lea.hbm %s3359_s15, 16 }
 0x1e8   :  { %p2789_p2 = scmp.ne.s32.totalorder %s3359_s15, %s2788_s18  ;;  %p2792_p3 = scmp.lt.u32.totalorder %s2788_s18, %s3359_s15 }
 0x1ea   :  { %p2794_p4 = pnand %p2792_p3, %p2789_p2 }
 0x1ec   :  { %2797 = shalt.err (!%p2794_p4)
}
 0x1ed   :  { %s2798_s22 = scalar_lea.vmem %s342_s12, 16  ;;  %s2802_s23 = scalar_lea.vmem %s342_s12, 32 }
 0x1ee   :  { %p2799_p5 = scmp.ne.s32.totalorder %s342_s12, %s2798_s22  ;;  %p2803_p6 = scmp.lt.s32.totalorder %s342_s12, %s342_s12 }
 0x1ef   :  { %p2804_p7 = scmp.lt.s32.totalorder %s2802_s23, %s2798_s22 }
 0x1f1   :  { %p2805_p8 = por %p2804_p7, %p2803_p6 }
 0x1f3   :  { %p2806_p9 = pnand %p2805_p8, %p2799_p5 }
 0x1f5   :  { %2809 = shalt.err (!%p2806_p9)
}
 0x1f6   :  { %344 = dma.hbm_to_vmem [thread:$0]  %s3359_s15, 16, %s342_s12, [#allocation38]  }
 0x1f7   :  { %2810 = dma.done.wait [#allocation3], 32  }
 0x1f8   :  { %2811 = vsyncadd [#allocation3], 4294967264 }
 0x1f9   :  { %2812 = dma.done.wait [#allocation5], 528  }
 0x1fa   :  { %2813 = vsyncadd [#allocation5], 4294966768 }
 0x1fb   :  { %2814 = dma.done.wait [#allocation8], 528  }
 0x1fc   :  { %2815 = vsyncadd [#allocation8], 4294966768 }
 0x1fd   :  { %2816 = dma.done.wait [#allocation11], 528  }
 0x1fe   :  { %2817 = vsyncadd [#allocation11], 4294966768 }
 0x1ff   :  { %2818 = dma.done.wait [#allocation14], 48  }
 0x200   :  { %2819 = vsyncadd [#allocation14], 4294967248 }
 0x201   :  { %2820 = dma.done.wait [#allocation17], 528  }
 0x202   :  { %2821 = vsyncadd [#allocation17], 4294966768 }
 0x203   :  { %2822 = dma.done.wait [#allocation20], 528  }
 0x204   :  { %2823 = vsyncadd [#allocation20], 4294966768 }
 0x205   :  { %2824 = dma.done.wait [#allocation23], 528  }
 0x206   :  { %2825 = vsyncadd [#allocation23], 4294966768 }
 0x207   :  { %2826 = dma.done.wait [#allocation26], 48  }
 0x208   :  { %2827 = vsyncadd [#allocation26], 4294967248 }
 0x209   :  { %2828 = dma.done.wait [#allocation29], 528  }
 0x20a   :  { %2829 = vsyncadd [#allocation29], 4294966768 }
 0x20b   :  { %2830 = dma.done.wait [#allocation32], 528  }
 0x20c   :  { %2831 = vsyncadd [#allocation32], 4294966768 }
 0x20d   :  { %2832 = dma.done.wait [#allocation35], 528  }
 0x20e   :  { %2833 = vsyncadd [#allocation35], 4294966768 }
 0x20f   :  { %2834 = dma.done.wait [#allocation38], 16  }
 0x210   :  { %2835 = vsyncadd [#allocation38], 4294967280  ;;  %s3360_s16 = sld [smem:[#allocation52_spill]]  ;;  %v2895_v0 = vmov 0.0   ;;  %vm2896_vm0 = vmmov 0   ;;  %v2897_v1 = vmov 0.0|0.0  }
 0x211   :  { %1986 = vmatprep.subr.mxu1 %v2895_v0  ;;  %1988 = vmatprep.mubr.msk.f32.mxu1 %vm2896_vm0, %v2895_v0  ;;  %vm461_vm1 = vcmask 1041408   ;;  %vm457_vm2 = vcmask 15360   ;;  %v434_v2 = vld [vmem:[#allocation2] sm:$0x3]  ;;  %v436_v4 = vld [vmem:[#allocation6] sm:$0xff]  ;;  %v437_v5 = vld [vmem:[#allocation6 + $0x8] sm:$0xff] }
 0x212   :  { %2144 = vmatprep.subr.bf16.mxu0 %v2897_v1  ;;  %2010 = vmatprep.mubr.msk.f32.mxu0 %vm2896_vm0, %v2895_v0  ;;  %v2139_v6 = vpack.c.bf16 %v437_v5, %v436_v4  ;;  %v438_v7 = vld [vmem:[#allocation6 + $0x10] sm:$0xff]  ;;  %v439_v8 = vld [vmem:[#allocation6 + $0x18] sm:$0xff]  ;;  %v441_v10 = vld [vmem:[#allocation9] sm:$0xff]  ;;  %vm544_vm4 = vcmask 261120   ;;  %s2898_s9 = smov 2   ;;  %s2899_s26 = smov 126  }
 0x213   :  { %1987 = vmatpush3.msk.msra.mxu1 %vm461_vm1, %v434_v2  ;;  %v2142_v9 = vpack.c.bf16 %v439_v8, %v438_v7  ;;  %v442_v11 = vld [vmem:[#allocation9 + $0x8] sm:$0xff]  ;;  %v1882_v13 = vld [vmem:[#allocation4] ss:$0 sm:$0xff]  ;;  %v443_v22 = vld [vmem:[#allocation9 + $0x10] sm:$0xff]  ;;  %s3361_s17 = sld [smem:[#allocation63_spill]]  ;;  %s3362_s28 = sld [smem:[#allocation65_spill]] }
 0x214   :  { %2138 = vmatprep.subr.bf16.mxu1 %v2897_v1  ;;  %v2145_v12 = vpack.c.bf16 %v442_v11, %v441_v10  ;;  %v446_v15 = vld [vmem:[#allocation12] sm:$0xff]  ;;  %v447_v16 = vld [vmem:[#allocation12 + $0x8] sm:$0xff]  ;;  %v444_v23 = vld [vmem:[#allocation9 + $0x18] sm:$0xff]  ;;  %s3363_s27 = sld [smem:[#allocation67_spill]]  ;;  %s3364_s8 = sld [smem:[#allocation64_spill]]  ;;  %vm1830_vm12 = vcmask 31744  }
 0x215   :  { %v2151_v20 = vpack.c.bf16 %v447_v16, %v446_v15  ;;  %v448_v24 = vld [vmem:[#allocation12 + $0x10] sm:$0xff]  ;;  %v2148_v25 = vpack.c.bf16 %v444_v23, %v443_v22  ;;  %v449_v26 = vld [vmem:[#allocation12 + $0x18] sm:$0xff]  ;;  %v788_v41 = vld [vmem:[#allocation15] sm:$0x3]  ;;  %s3365_s25 = sld [smem:[#allocation66_spill]] }
 0x216   :  { %v3205_v3 = vld [vmem:[%s3360_s16] sm:$0xff]  ;;  %2146 = vmatpush3.bf16.msra.mxu0 %v2145_v12  ;;  %v2154_v27 = vpack.c.bf16 %v449_v26, %v448_v24  ;;  %v1889_v43 = vld [vmem:[#allocation13] ss:$0 sm:$0xff]  ;;  %v790_v49 = vld [vmem:[#allocation18] sm:$0xff] }
 0x217   :  { %1989 = vmatmul.mubr.msk.f32.vlgmr.msra.gmra.mrb[0].mxu1 %vm457_vm2, %v3205_v3  ;;  %2147 = vmatprep.subr.bf16.mxu0 %v2897_v1  ;;  %v1885_v28 = vld [vmem:[#allocation7] ss:$0 sm:$0xff]  ;;  %v1887_v34 = vld [vmem:[#allocation10] ss:$0 sm:$0xff]  ;;  %v791_v50 = vld [vmem:[#allocation18 + $0x8] sm:$0xff] }
 0x218   :  { %1999 = vmatprep.mubr.msk.f32.mxu1 %vm2896_vm0, %v2895_v0  ;;  %2140 = vmatpush3.bf16.msra.mxu1 %v2139_v6  ;;  %v2157_v51 = vpack.c.bf16 %v791_v50, %v790_v49  ;;  %v792_v53 = vld [vmem:[#allocation18 + $0x10] sm:$0xff]  ;;  %v793_v54 = vld [vmem:[#allocation18 + $0x18] sm:$0xff]  ;;  %v795_v56 = vld [vmem:[#allocation21] sm:$0xff] }
 0x219   :  { %2141 = vmatprep.subr.bf16.mxu1 %v2897_v1  ;;  %v2160_v55 = vpack.c.bf16 %v793_v54, %v792_v53  ;;  %v796_v57 = vld [vmem:[#allocation21 + $0x8] sm:$0xff]  ;;  %v1891_v59 = vld [vmem:[#allocation16] ss:$0 sm:$0xff]  ;;  %v797_v7 = vld [vmem:[#allocation21 + $0x10] sm:$0xff] }
 0x21a   :  { %2149 = vmatpush3.bf16.msra.mxu0 %v2148_v25  ;;  %v2163_v58 = vpack.c.bf16 %v796_v57, %v795_v56  ;;  %v800_v61 = vld [vmem:[#allocation24] sm:$0xff]  ;;  %v801_v62 = vld [vmem:[#allocation24 + $0x8] sm:$0xff]  ;;  %v798_v8 = vld [vmem:[#allocation21 + $0x18] sm:$0xff] }
 0x21b   :  { %2024 = vmatprep.subr.mxu0 %v2895_v0  ;;  %v2169_v5 = vpack.c.bf16 %v801_v62, %v800_v61  ;;  %v2166_v10 = vpack.c.bf16 %v798_v8, %v797_v7  ;;  %v803_v11 = vld [vmem:[#allocation24 + $0x18] sm:$0xff]  ;;  %v1148_v54 = vld [vmem:[#allocation36 + $0x18] sm:$0xff] }
 0x21c   :  { %2143 = vmatpush3.bf16.msra.mxu1 %v2142_v9  ;;  %v802_v9 = vld [vmem:[#allocation24 + $0x10] sm:$0xff]  ;;  %v1142_v50 = vld [vmem:[#allocation33 + $0x10] sm:$0xff]  ;;  %v1903_v56 = vld [vmem:[#allocation31] ss:$0 sm:$0xff] }
 0x21d   :  { %2150 = vmatprep.subr.bf16.mxu1 %v2897_v1  ;;  %v2172_v12 = vpack.c.bf16 %v803_v11, %v802_v9  ;;  %v1905_v62 = vld [vmem:[#allocation34] ss:$0 sm:$0xff] }
 0x2ea   :  { %v531_v14 = vpop.f32.mrb[0].mxu1 }
 0x2eb   :  { %v532_v17 = vadd.f32 %v1882_v13, %v531_v14  ;;  %v1990_v18 = vpop.f32.mrb[1].mxu1  ;;  %v1894_v13 = vld [vmem:[#allocation19] ss:$0 sm:$0xff] }
 0x2ed   :  { %vm535_vm3 = vcmp.ge.f32.partialorder %v532_v17, 0.0  ;;  %v536_v19 = vmul.f32 0.01, %v532_v17 }
 0x2ef   :  { %v537_v21 = vsel %vm535_vm3, %v532_v17, %v536_v19  ;;  %v1133_v19 = vld [vmem:[#allocation27] sm:$0x3] }
 0x2f0   :  { %2000 = vmatmul.mubr.msk.f32.vlgmr.msra.gmra.mrb[2].mxu1 %vm544_vm4, %v537_v21 }
 0x2f1   :  { %2152 = vmatpush3.bf16.msra.mxu1 %v2151_v20  ;;  %2021 = vmatprep.mubr.msk.f32.mxu1 %vm2896_vm0, %v2895_v0  ;;  %v1896_v20 = vld [vmem:[#allocation22] ss:$0 sm:$0xff] }
 0x2f2   :  { %2153 = vmatprep.subr.bf16.mxu1 %v2897_v1 }
 0x2f5   :  { %2155 = vmatpush3.bf16.msra.mxu1 %v2154_v27  ;;  %v1898_v27 = vld [vmem:[#allocation25] ss:$0 sm:$0xff] }
 0x2f6   :  { %2162 = vmatprep.subr.bf16.mxu1 %v2897_v1 }
 0x3c3   :  { %v614_v29 = vpop.f32.mrb[2].mxu1 }
 0x3c4   :  { %v615_v30 = vadd.f32 %v1885_v28, %v614_v29  ;;  %v2001_v31 = vpop.f32.mrb[3].mxu1  ;;  %v1135_v28 = vld [vmem:[#allocation30] sm:$0xff]  ;;  %v1136_v29 = vld [vmem:[#allocation30 + $0x8] sm:$0xff] }
 0x3c6   :  { %vm618_vm5 = vcmp.ge.f32.partialorder %v615_v30, 0.0  ;;  %v619_v32 = vmul.f32 0.01, %v615_v30 }
 0x3c8   :  { %v620_v33 = vsel %vm618_vm5, %v615_v30, %v619_v32 }
 0x3c9   :  { %2011 = vmatmul.mubr.msk.f32.vlgmr.msra.gmra.mrb[0].mxu0 %vm544_vm4, %v620_v33  ;;  %2022 = vmatmul.mubr.msk.f32.vlgmr.msra.gmra.mrb[4].mxu1 %vm544_vm4, %v620_v33  ;;  %v2175_v33 = vpack.c.bf16 %v1136_v29, %v1135_v28  ;;  %v1497_v28 = vld [vmem:[%s3063_s20 + $0x8] sm:$0xff] }
 0x3ca   :  { %2026 = vmatprep.mubr.msk.f32.mxu0 %vm2896_vm0, %v2895_v0  ;;  %2048 = vmatprep.mubr.msk.f32.mxu1 %vm2896_vm0, %v2895_v0 }
 0x3cb   :  { %2025 = vmatpush3.msk.msra.mxu0 %vm461_vm1, %v788_v41  ;;  %2164 = vmatpush3.bf16.msra.mxu1 %v2163_v58 }
 0x3cc   :  { %2156 = vmatprep.subr.bf16.mxu0 %v2897_v1  ;;  %2165 = vmatprep.subr.bf16.mxu1 %v2897_v1 }
 0x3cf   :  { %2167 = vmatpush3.bf16.msra.mxu1 %v2166_v10  ;;  %v1484_v10 = vld [vmem:[%s3361_s17] sm:$0x3] }
 0x3d0   :  { %2062 = vmatprep.subr.mxu1 %v2895_v0 }
 0x49c   :  { %v696_v35 = vpop.f32.mrb[0].mxu0  ;;  %v772_v36 = vpop.f32.mrb[4].mxu1 }
 0x49d   :  { %v697_v37 = vadd.f32 %v1887_v34, %v696_v35  ;;  %v2012_v38 = vpop.f32.mrb[1].mxu0  ;;  %v2023_v39 = vpop.f32.mrb[5].mxu1  ;;  %v773_v44 = vadd.f32 %v1889_v43, %v772_v36  ;;  %v1137_v35 = vld [vmem:[#allocation30 + $0x10] sm:$0xff]  ;;  %v1138_v36 = vld [vmem:[#allocation30 + $0x18] sm:$0xff] }
 0x49e   :  { %v1140_v38 = vld [vmem:[#allocation33] sm:$0xff]  ;;  %v1146_v43 = vld [vmem:[#allocation36 + $0x8] sm:$0xff] }
 0x49f   :  { %v776_v40 = vmul.f32 1.442695, %v697_v37  ;;  %v2178_v37 = vpack.c.bf16 %v1138_v36, %v1137_v35  ;;  %v1493_v35 = vld [vmem:[%s3363_s27 + $0x10] sm:$0xff]  ;;  %v1494_v36 = vld [vmem:[%s3363_s27 + $0x18] sm:$0xff] }
 0x4a1   :  { %2274 = vpow2.f32 %v776_v40  ;;  %v1900_v40 = vld [vmem:[#allocation28] ss:$0 sm:$0xff] }
 0x4ab   :  { %v2275_v42 = vpop.eup %2274 }
 0x4ac   :  { %779 = vrot.lane.b32.xlu0 %v2275_v42, %s2898_s9  ;;  %v1145_v42 = vld [vmem:[#allocation36] sm:$0xff] }
 0x4b0   :  { %784 = vrot.lane.b32.xlu0 %v773_v44, %s2898_s9 }
 0x51e   :  { %v780_v45 = vpop.permute.xlu0 %779 }
 0x51f   :  { %v782_v46 = vmul.f32 %v780_v45, %v3205_v3 }
 0x522   :  { %v785_v47 = vpop.permute.xlu0 %784 }
 0x523   :  { %v3233_v48 = vadd.f32 %v785_v47, %v782_v46  ;;  %v2187_v47 = vpack.c.bf16 %v1146_v43, %v1145_v42 }
 0x525   :  { %812 = vrot.lane.b32.xlu1 %v3233_v48, %s2899_s26 }
 0x597   :  { %v813_v52 = vpop.permute.xlu1 %812 }
 0x598   :  { %2027 = vmatmul.mubr.msk.f32.vlgmr.msra.gmra.mrb[2].mxu0 %vm457_vm2, %v813_v52  ;;  %v1147_v52 = vld [vmem:[#allocation36 + $0x10] sm:$0xff] }
 0x599   :  { %2158 = vmatpush3.bf16.msra.mxu0 %v2157_v51  ;;  %2037 = vmatprep.mubr.msk.f32.mxu0 %vm2896_vm0, %v2895_v0  ;;  %v1143_v51 = vld [vmem:[#allocation33 + $0x18] sm:$0xff] }
 0x59a   :  { %2159 = vmatprep.subr.bf16.mxu0 %v2897_v1  ;;  %v2184_v53 = vpack.c.bf16 %v1143_v51, %v1142_v50 }
 0x59d   :  { %2161 = vmatpush3.bf16.msra.mxu0 %v2160_v55  ;;  %v2190_v55 = vpack.c.bf16 %v1148_v54, %v1147_v52  ;;  %v1916_v52 = vld [vmem:[%s3068_s14] ss:$0 sm:$0xff] }
 0x59e   :  { %2168 = vmatprep.subr.bf16.mxu0 %v2897_v1 }
 0x66b   :  { %v885_v60 = vpop.f32.mrb[2].mxu0 }
 0x66c   :  { %v886_v63 = vadd.f32 %v1891_v59, %v885_v60  ;;  %v2028_v2 = vpop.f32.mrb[3].mxu0 }
 0x66e   :  { %vm889_vm6 = vcmp.ge.f32.partialorder %v886_v63, 0.0  ;;  %v890_v4 = vmul.f32 0.01, %v886_v63 }
 0x670   :  { %v891_v6 = vsel %vm889_vm6, %v886_v63, %v890_v4  ;;  %v1907_v63 = vld [vmem:[#allocation37] ss:$0 sm:$0xff] }
 0x671   :  { %2038 = vmatmul.mubr.msk.f32.vlgmr.msra.gmra.mrb[4].mxu0 %vm544_vm4, %v891_v6 }
 0x672   :  { %2170 = vmatpush3.bf16.msra.mxu0 %v2169_v5  ;;  %2059 = vmatprep.mubr.msk.f32.mxu0 %vm2896_vm0, %v2895_v0 }
 0x673   :  { %2171 = vmatprep.subr.bf16.mxu0 %v2897_v1 }
 0x676   :  { %2173 = vmatpush3.bf16.msra.mxu0 %v2172_v12 }
 0x677   :  { %2180 = vmatprep.subr.bf16.mxu0 %v2897_v1 }
 0x744   :  { %v967_v14 = vpop.f32.mrb[4].mxu0 }
 0x745   :  { %v968_v15 = vadd.f32 %v1894_v13, %v967_v14  ;;  %v2039_v16 = vpop.f32.mrb[5].mxu0 }
 0x746   :  { %v1486_v16 = vld [vmem:[%s3362_s28] sm:$0xff] }
 0x747   :  { %vm971_vm7 = vcmp.ge.f32.partialorder %v968_v15, 0.0  ;;  %v972_v17 = vmul.f32 0.01, %v968_v15 }
 0x749   :  { %v973_v18 = vsel %vm971_vm7, %v968_v15, %v972_v17  ;;  %v1487_v17 = vld [vmem:[%s3362_s28 + $0x8] sm:$0xff] }
 0x74a   :  { %2049 = vmatmul.mubr.msk.f32.vlgmr.msra.gmra.mrb[6].mxu1 %vm544_vm4, %v973_v18  ;;  %2060 = vmatmul.mubr.msk.f32.vlgmr.msra.gmra.mrb[6].mxu0 %vm544_vm4, %v973_v18  ;;  %v2193_v18 = vpack.c.bf16 %v1487_v17, %v1486_v16 }
 0x74b   :  { %2064 = vmatprep.mubr.msk.f32.mxu1 %vm2896_vm0, %v2895_v0  ;;  %2086 = vmatprep.mubr.msk.f32.mxu0 %vm2896_vm0, %v2895_v0 }
 0x74c   :  { %2063 = vmatpush3.msk.msra.mxu1 %vm461_vm1, %v1133_v19 }
 0x74d   :  { %2174 = vmatprep.subr.bf16.mxu1 %v2897_v1 }
 0x81d   :  { %v1049_v21 = vpop.f32.mrb[6].mxu1  ;;  %v1125_v22 = vpop.f32.mrb[6].mxu0 }
 0x81e   :  { %v1050_v23 = vadd.f32 %v1896_v20, %v1049_v21  ;;  %v2050_v24 = vpop.f32.mrb[7].mxu1  ;;  %v2061_v25 = vpop.f32.mrb[7].mxu0  ;;  %v1126_v31 = vadd.f32 %v1898_v27, %v1125_v22  ;;  %v1489_v20 = vld [vmem:[%s3362_s28 + $0x18] sm:$0xff]  ;;  %v1491_v22 = vld [vmem:[%s3363_s27] sm:$0xff] }
 0x81f   :  { %v1909_v25 = vld [vmem:[%s3364_s8] ss:$0 sm:$0xff] }
 0x820   :  { %v1129_v26 = vmul.f32 1.442695, %v1050_v23  ;;  %v1492_v23 = vld [vmem:[%s3363_s27 + $0x8] sm:$0xff]  ;;  %v1496_v27 = vld [vmem:[%s3063_s20] sm:$0xff] }
 0x821   :  { %v2199_v24 = vpack.c.bf16 %v1492_v23, %v1491_v22 }
 0x822   :  { %2276 = vpow2.f32 %v1129_v26 }
 0x82c   :  { %v2277_v30 = vpop.eup %2276 }
 0x82d   :  { %v1131_v32 = vmul.f32 %v2277_v30, %v3205_v3  ;;  %v1141_v3 = vld [vmem:[#allocation33 + $0x8] sm:$0xff] }
 0x82e   :  { %v2181_v39 = vpack.c.bf16 %v1141_v3, %v1140_v38  ;;  %v2202_v38 = vpack.c.bf16 %v1494_v36, %v1493_v35  ;;  %v1499_v3 = vld [vmem:[%s3063_s20 + $0x18] sm:$0xff] }
 0x82f   :  { %v3258_v34 = vadd.f32 %v1131_v32, %v1126_v31  ;;  %v2205_v32 = vpack.c.bf16 %v1497_v28, %v1496_v27 }
 0x830   :  { %2182 = vmatpush3.bf16.msra.mxu0 %v2181_v39 }
 0x831   :  { %2065 = vmatmul.mubr.msk.f32.vlgmr.msra.gmra.mrb[8].mxu1 %vm457_vm2, %v3258_v34  ;;  %2183 = vmatprep.subr.bf16.mxu0 %v2897_v1 }
 0x832   :  { %2176 = vmatpush3.bf16.msra.mxu1 %v2175_v33  ;;  %2075 = vmatprep.mubr.msk.f32.mxu1 %vm2896_vm0, %v2895_v0 }
 0x833   :  { %2177 = vmatprep.subr.bf16.mxu1 %v2897_v1 }
 0x834   :  { %2185 = vmatpush3.bf16.msra.mxu0 %v2184_v53 }
 0x835   :  { %2100 = vmatprep.subr.mxu0 %v2895_v0 }
 0x836   :  { %2179 = vmatpush3.bf16.msra.mxu1 %v2178_v37  ;;  %v1498_v37 = vld [vmem:[%s3063_s20 + $0x10] sm:$0xff] }
 0x837   :  { %2186 = vmatprep.subr.bf16.mxu1 %v2897_v1  ;;  %v2208_v39 = vpack.c.bf16 %v1499_v3, %v1498_v37 }
 0x904   :  { %v1228_v41 = vpop.f32.mrb[8].mxu1 }
 0x905   :  { %v1229_v44 = vadd.f32 %v1900_v40, %v1228_v41  ;;  %v2066_v45 = vpop.f32.mrb[9].mxu1  ;;  %v1912_v40 = vld [vmem:[%s3365_s25] ss:$0 sm:$0xff] }
 0x907   :  { %vm1232_vm8 = vcmp.ge.f32.partialorder %v1229_v44, 0.0  ;;  %v1233_v46 = vmul.f32 0.01, %v1229_v44 }
 0x909   :  { %v1234_v49 = vsel %vm1232_vm8, %v1229_v44, %v1233_v46 }
 0x90a   :  { %2076 = vmatmul.mubr.msk.f32.vlgmr.msra.gmra.mrb[10].mxu1 %vm544_vm4, %v1234_v49 }
 0x90b   :  { %2188 = vmatpush3.bf16.msra.mxu1 %v2187_v47  ;;  %2097 = vmatprep.mubr.msk.f32.mxu1 %vm2896_vm0, %v2895_v0 }
 0x90c   :  { %2189 = vmatprep.subr.bf16.mxu1 %v2897_v1 }
 0x90f   :  { %2191 = vmatpush3.bf16.msra.mxu1 %v2190_v55 }
 0x910   :  { %2198 = vmatprep.subr.bf16.mxu1 %v2897_v1 }
 0x9dd   :  { %v1310_v57 = vpop.f32.mrb[10].mxu1 }
 0x9de   :  { %v1311_v58 = vadd.f32 %v1903_v56, %v1310_v57  ;;  %v2077_v59 = vpop.f32.mrb[11].mxu1 }
 0x9e0   :  { %vm1314_vm9 = vcmp.ge.f32.partialorder %v1311_v58, 0.0  ;;  %v1315_v60 = vmul.f32 0.01, %v1311_v58 }
 0x9e2   :  { %v1316_v61 = vsel %vm1314_vm9, %v1311_v58, %v1315_v60 }
 0x9e3   :  { %2087 = vmatmul.mubr.msk.f32.vlgmr.msra.gmra.mrb[8].mxu0 %vm544_vm4, %v1316_v61  ;;  %2098 = vmatmul.mubr.msk.f32.vlgmr.msra.gmra.mrb[12].mxu1 %vm544_vm4, %v1316_v61 }
 0x9e4   :  { %2102 = vmatprep.mubr.msk.f32.mxu0 %vm2896_vm0, %v2895_v0  ;;  %2124 = vmatprep.mubr.msk.f32.mxu1 %vm2896_vm0, %v2895_v0 }
 0x9e5   :  { %2101 = vmatpush3.msk.msra.mxu0 %vm461_vm1, %v1484_v10  ;;  %2200 = vmatpush3.bf16.msra.mxu1 %v2199_v24 }
 0x9e6   :  { %2192 = vmatprep.subr.bf16.mxu0 %v2897_v1  ;;  %2201 = vmatprep.subr.bf16.mxu1 %v2897_v1 }
 0x9e9   :  { %2203 = vmatpush3.bf16.msra.mxu1 %v2202_v38 }
 0xab6   :  { %v1392_v2 = vpop.f32.mrb[8].mxu0  ;;  %v1468_v4 = vpop.f32.mrb[12].mxu1 }
 0xab7   :  { %v1393_v5 = vadd.f32 %v1905_v62, %v1392_v2  ;;  %v1469_v6 = vadd.f32 %v1907_v63, %v1468_v4  ;;  %v2088_v7 = vpop.f32.mrb[9].mxu0  ;;  %v2099_v8 = vpop.f32.mrb[13].mxu1 }
 0xab9   :  { %v1472_v9 = vmul.f32 1.442695, %v1393_v5  ;;  %1480 = vrot.lane.b32.xlu0 %v1469_v6, %s2898_s9 }
 0xabb   :  { %2278 = vpow2.f32 %v1472_v9 }
 0xac5   :  { %v2279_v11 = vpop.eup %2278 }
 0xac6   :  { %1475 = vrot.lane.b32.xlu1 %v2279_v11, %s2898_s9 }
 0xb2b   :  { %v1481_v14 = vpop.permute.xlu0 %1480 }
 0xb38   :  { %v1476_v12 = vpop.permute.xlu1 %1475 }
 0xb39   :  { %v1478_v13 = vmul.f32 %v1476_v12, %v3233_v48  ;;  %v1488_v48 = vld [vmem:[%s3362_s28 + $0x10] sm:$0xff] }
 0xb3a   :  { %v2196_v21 = vpack.c.bf16 %v1489_v20, %v1488_v48 }
 0xb3b   :  { %v3285_v15 = vadd.f32 %v1481_v14, %v1478_v13 }
 0xb3d   :  { %1508 = vrot.lane.b32.xlu1 %v3285_v15, %s2899_s26 }
 0xbaf   :  { %v1509_v19 = vpop.permute.xlu1 %1508 }
 0xbb0   :  { %2103 = vmatmul.mubr.msk.f32.vlgmr.msra.gmra.mrb[10].mxu0 %vm457_vm2, %v1509_v19 }
 0xbb1   :  { %2194 = vmatpush3.bf16.msra.mxu0 %v2193_v18  ;;  %2113 = vmatprep.mubr.msk.f32.mxu0 %vm2896_vm0, %v2895_v0 }
 0xbb2   :  { %2195 = vmatprep.subr.bf16.mxu0 %v2897_v1 }
 0xbb5   :  { %2197 = vmatpush3.bf16.msra.mxu0 %v2196_v21 }
 0xbb6   :  { %2204 = vmatprep.subr.bf16.mxu0 %v2897_v1 }
 0xc83   :  { %v1581_v26 = vpop.f32.mrb[10].mxu0 }
 0xc84   :  { %v1582_v29 = vadd.f32 %v1909_v25, %v1581_v26  ;;  %v2104_v30 = vpop.f32.mrb[11].mxu0 }
 0xc86   :  { %vm1585_vm10 = vcmp.ge.f32.partialorder %v1582_v29, 0.0  ;;  %v1586_v31 = vmul.f32 0.01, %v1582_v29 }
 0xc88   :  { %v1587_v33 = vsel %vm1585_vm10, %v1582_v29, %v1586_v31 }
 0xc89   :  { %2114 = vmatmul.mubr.msk.f32.vlgmr.msra.gmra.mrb[12].mxu0 %vm544_vm4, %v1587_v33 }
 0xc8a   :  { %2206 = vmatpush3.bf16.msra.mxu0 %v2205_v32  ;;  %2135 = vmatprep.mubr.msk.f32.mxu0 %vm2896_vm0, %v2895_v0  ;;  %v1914_v0 = vld [vmem:[%s3058_s3] ss:$0 sm:$0xff] }
 0xc8b   :  { %2207 = vmatprep.subr.bf16.mxu0 %v2897_v1 }
 0xc8e   :  { %2209 = vmatpush3.bf16.msra.mxu0 %v2208_v39 }
 0xd5c   :  { %v1663_v41 = vpop.f32.mrb[12].mxu0 }
 0xd5d   :  { %v1664_v42 = vadd.f32 %v1912_v40, %v1663_v41  ;;  %v2115_v43 = vpop.f32.mrb[13].mxu0 }
 0xd5f   :  { %vm1667_vm11 = vcmp.ge.f32.partialorder %v1664_v42, 0.0  ;;  %v1668_v44 = vmul.f32 0.01, %v1664_v42 }
 0xd61   :  { %v1669_v45 = vsel %vm1667_vm11, %v1664_v42, %v1668_v44 }
 0xd62   :  { %2125 = vmatmul.mubr.msk.f32.vlgmr.msra.gmra.mrb[14].mxu1 %vm544_vm4, %v1669_v45  ;;  %2136 = vmatmul.mubr.msk.f32.vlgmr.msra.gmra.mrb[14].mxu0 %vm544_vm4, %v1669_v45 }
 0xe35   :  { %v1745_v1 = vpop.f32.mrb[14].mxu1  ;;  %v1821_v46 = vpop.f32.mrb[14].mxu0 }
 0xe36   :  { %v1746_v47 = vadd.f32 %v1914_v0, %v1745_v1  ;;  %v2126_v49 = vpop.f32.mrb[15].mxu1  ;;  %v2137_v50 = vpop.f32.mrb[15].mxu0  ;;  %v1822_v54 = vadd.f32 %v1916_v52, %v1821_v46 }
 0xe38   :  { %v1825_v51 = vmul.f32 1.442695, %v1746_v47 }
 0xe3a   :  { %2280 = vpow2.f32 %v1825_v51 }
 0xe44   :  { %v2281_v53 = vpop.eup %2280 }
 0xe45   :  { %v1827_v55 = vmul.f32 %v2281_v53, %v3258_v34 }
 0xe47   :  { %v1828_v56 = vadd.f32 %v1827_v55, %v1822_v54 }
 0xe49   :  { %v1829_v57 = vsel %vm457_vm2, %v1828_v56, %v3285_v15 }
 0xe4a   :  { %1831 = vst.msk [vmem:[%s3073_s4] sm:$0xff] %vm1830_vm12, %v1829_v57 }
 0xe4b   :  { %1836 = vsyncpa [#allocation3], 1 }
 0xe4c   :  { %1837 = vsyncpa [#allocation5], 1 }
 0xe4d   :  { %1838 = vsyncpa [#allocation8], 1 }
 0xe4e   :  { %1839 = vsyncpa [#allocation11], 1 }
 0xe4f   :  { %1840 = vsyncpa [#allocation14], 1 }
 0xe50   :  { %1841 = vsyncpa [#allocation17], 1 }
 0xe51   :  { %1842 = vsyncpa [#allocation20], 1 }
 0xe52   :  { %1843 = vsyncpa [#allocation23], 1 }
 0xe53   :  { %1844 = vsyncpa [#allocation26], 1 }
 0xe54   :  { %1845 = vsyncpa [#allocation29], 1 }
 0xe55   :  { %1846 = vsyncpa [#allocation32], 1 }
 0xe56   :  { %1847 = vsyncpa [#allocation35], 1 }
 0xe57   :  { %1848 = vsyncpa [#allocation38], 1 }

</bundles_post_ra>
